<compile_context>
chip_gen: v6e
topology: v6e:2x2x1
jax: 0.10.0
libtpu: 0.0.40
codegen_flags: <defaults>
</compile_context>

<pallas_src>
import numpy as np
import jax
import jax.numpy as jnp
from jax.experimental import pallas as pl
from jax.experimental.pallas import tpu as pltpu


# ----------------------------------------------------------------------------- kernel ---

def _make_kernel(H, W, C):
    L = W * C

    def dot(a, b):
        return jnp.dot(a, b, preferred_element_type=jnp.float32)

    def kernel(x_ref, mats_ref, rows_ref, o_ref):
        def mat(k):                                   # (L, L) weight block (static slice)
            return mats_ref[k * L:(k + 1) * L, :]

        def row(k):                                   # (1, L) bias / alpha row
            return rows_ref[k:k + 1, :]

        def hpad(a):                                  # reflect-pad along H, in-kernel
            return jnp.concatenate([a[1:2], a, a[H - 2:H - 1]], axis=0)

        def conv3x3(a, base):                         # 3 accumulating MXU dots, no im2col
            ap = hpad(a)
            acc = dot(ap[0:H], mat(base))
            acc = acc + dot(ap[1:H + 1], mat(base + 1))
            acc = acc + dot(ap[2:H + 2], mat(base + 2))
            return acc

        def ctree(v, op):                             # full-128-lane cyclic channel reduce
            t = v
            shift = W
            while shift < L:                          # shifts W, 2W, 4W, ... (C power of 2)
                t = op(t, pltpu.roll(t, shift, axis=1))
                shift *= 2
            return t

        x = x_ref[0]                                  # (H, L), natural x*C + c lanes

        # conv1 (+bias) + per-channel PReLU.  Output lives in channel-major lanes c*W + x.
        r = conv3x3(x, 0) + row(0)
        r = jnp.where(r > 0, r, row(1) * r)
        # conv2 (+bias)
        r = conv3x3(r, 3) + row(2)

        # ---- spatial attention: per-pixel channel max/mean replicated over the C blocks,
        #      3x3 conv(avg,max)->1 as six block-diagonal dots (dx taps folded in wrapper) --
        max_c = ctree(r, jnp.maximum)
        avg_c = ctree(r, jnp.add) * (1.0 / C)
        avgp = hpad(avg_c)
        maxp = hpad(max_c)
        s = dot(avgp[0:H], mat(6)) + dot(maxp[0:H], mat(7))
        s = s + dot(avgp[1:H + 1], mat(8)) + dot(maxp[1:H + 1], mat(9))
        s = s + dot(avgp[2:H + 2], mat(10)) + dot(maxp[2:H + 2], mat(11))
        sa = r * jax.nn.sigmoid(s + row(4))

        # ---- channel attention (squeeze -> PReLU -> excite), kept 128-lane wide ----------
        mean_hw = jnp.mean(r, axis=0, keepdims=True)          # (1, L), mean over H
        c1 = dot(mean_hw, mat(14)) + row(6)                   # data only in lanes < Cr
        c1 = jnp.where(c1 > 0, c1, row(7) * c1)
        gate_c = jax.nn.sigmoid(dot(c1, mat(15)) + row(5))    # (1, L) lane-dense gate
        ca = r * gate_c

        # ---- tail 1x1 conv (split over [sa | ca]; columns back in natural lanes) + residual
        tail = dot(sa, mat(12)) + dot(ca, mat(13)) + row(3)
        o_ref[0] = (x + tail).astype(o_ref.dtype)

    return kernel


# ------------------------------------------------------------------- parameter packing ---

def _reflect(i, n):
    if i < 0:
        return -i
    if i >= n:
        return 2 * (n - 1) - i
    return i


def prepare_params(params, W, C):
    """Pack all module parameters into two kernel slabs. Called ONCE, outside jit."""
    L = W * C
    Cr = int(np.asarray(params["wc1"]).shape[1])

    # Reflect-tap selector: M[dx, x_src, x_dst] = 1 iff reflect(x_dst + dx - 1) == x_src.
    M = np.zeros((3, W, W), np.float32)
    for x in range(W):
        for dx in range(3):
            M[dx, _reflect(x + dx - 1, W), x] += 1.0

    w1 = np.asarray(params["w1"], np.float32)    # (3, 3, C, C)  HWIO
    w2 = np.asarray(params["w2"], np.float32)
    wsp = np.asarray(params["wsp"], np.float32)  # (3, 3, 2, 1)  HWIO (ch0=avg, ch1=max)
    wt = np.asarray(params["wt"], np.float32)    # (2C, C)
    wc1 = np.asarray(params["wc1"], np.float32)  # (C, Cr)
    wc2 = np.asarray(params["wc2"], np.float32)  # (Cr, C)

    eyeC = np.eye(C, dtype=np.float32)
    eyeW = np.eye(W, dtype=np.float32)

    blocks = []
    # conv1: rows in natural input layout (x_src*C + cin), cols channel-major (cout*W + x_dst)
    for dy in range(3):
        blocks.append(np.einsum("dio,dab->aiob", w1[dy], M).reshape(L, L))
    # conv2: channel-major -> channel-major
    for dy in range(3):
        blocks.append(np.einsum("dio,dab->iaob", w2[dy], M).reshape(L, L))
    # spatial attention: dx taps + W reflection folded per dy, block-diagonal over channels
    for dy in range(3):
        Ta = np.einsum("d,dab->ab", wsp[dy, :, 0, 0], M)      # avg-channel taps (W, W)
        Tm = np.einsum("d,dab->ab", wsp[dy, :, 1, 0], M)      # max-channel taps (W, W)
        blocks.append(np.kron(eyeC, Ta))
        blocks.append(np.kron(eyeC, Tm))
    # tail 1x1: channel-major inputs, natural (x*C + c) output columns
    blocks.append(np.einsum("io,ab->iabo", wt[:C, :], eyeW).reshape(L, L))
    blocks.append(np.einsum("io,ab->iabo", wt[C:, :], eyeW).reshape(L, L))
    # channel attention squeeze (W-mean folded into wc1) and excite (expansion folded in)
    aw1 = np.zeros((L, L), np.float32)
    aw1[:, :Cr] = np.repeat(wc1, W, axis=0) / float(W)
    blocks.append(aw1)
    w2e = np.zeros((L, L), np.float32)
    w2e[:Cr, :] = np.repeat(wc2, W, axis=1)
    blocks.append(w2e)
    mats = np.concatenate(blocks, axis=0)                     # (16*L, L)

    def cmajor(v):                                            # per-channel -> lane c*W + x
        return np.repeat(np.asarray(v, np.float32).reshape(-1), W)

    rows = np.zeros((8, L), np.float32)
    rows[0] = cmajor(params["b1"])
    rows[1] = cmajor(params["a1"])
    rows[2] = cmajor(params["b2"])
    rows[3] = np.tile(np.asarray(params["bt"], np.float32).reshape(-1), W)  # natural layout
    rows[4] = float(np.asarray(params["bsp"]).reshape(-1)[0])
    rows[5] = cmajor(params["bc2"])
    rows[6, :Cr] = np.asarray(params["bc1"], np.float32).reshape(-1)
    rows[7, :Cr] = np.asarray(params["ac"], np.float32).reshape(-1)

    return {"mats": jnp.asarray(mats), "rows": jnp.asarray(rows)}


# ----------------------------------------------------------------------------- wrapper ---

def dual_attention_block(x, consts):
    """x: (N, H, W, C) float32 NHWC; consts from prepare_params (built once)."""
    N, H, W, C = x.shape
    L = W * C
    assert C & (C - 1) == 0, "channel count must be a power of two for the roll tree"

    x3 = x.astype(jnp.float32).reshape(N, H, L)     # free reshape, no transpose needed

    # TODO(synk): for larger H/W, tile several H-row blocks per grid step (M >= 256 per MXU
    # dot) and re-budget the per-step working set for v7x's 64 MiB VMEM.
    out = pl.pallas_call(
        _make_kernel(H, W, C),
        out_shape=jax.ShapeDtypeStruct((N, H, L), jnp.float32),
        grid=(N,),
        in_specs=[
            pl.BlockSpec((1, H, L), lambda n: (n, 0, 0)),
            pl.BlockSpec((16 * L, L), lambda n: (0, 0)),
            pl.BlockSpec((8, L), lambda n: (0, 0)),
        ],
        out_specs=pl.BlockSpec((1, H, L), lambda n: (n, 0, 0)),
        compiler_params=pltpu.CompilerParams(dimension_semantics=("parallel",)),
    )(x3, consts["mats"], consts["rows"])
    return out.reshape(N, H, W, C)


# --------------------------------------------------------------------------- reference ---

def ref_forward(x, params):
    w1, b1, a1, w2, b2 = (params[k] for k in ("w1", "b1", "a1", "w2", "b2"))
    wsp, bsp = params["wsp"], params["bsp"]
    wc1, bc1, ac, wc2, bc2 = (params[k] for k in ("wc1", "bc1", "ac", "wc2", "bc2"))
    wt, bt = params["wt"], params["bt"]

    def conv3(a, w, b):
        ap = jnp.pad(a, ((0, 0), (1, 1), (1, 1), (0, 0)), mode="reflect")
        y = jax.lax.conv_general_dilated(
            ap, w, (1, 1), "VALID", dimension_numbers=("NHWC", "HWIO", "NHWC"))
        return y + b.reshape(1, 1, 1, -1)

    r = conv3(x, w1, b1)
    r = jnp.where(r > 0, r, a1.reshape(1, 1, 1, -1) * r)
    r = conv3(r, w2, b2)

    s = jnp.concatenate([jnp.mean(r, -1, keepdims=True),
                         jnp.max(r, -1, keepdims=True)], -1)
    s = conv3(s, wsp, bsp)
    sa = r * jax.nn.sigmoid(s)

    c = jnp.mean(r, axis=(1, 2), keepdims=True)
    c = jnp.einsum("nhwc,cd->nhwd", c, wc1) + bc1.reshape(1, 1, 1, -1)
    c = jnp.where(c > 0, c, ac.reshape(1, 1, 1, -1) * c)
    c = jnp.einsum("nhwc,cd->nhwd", c, wc2) + bc2.reshape(1, 1, 1, -1)
    ca = r * jax.nn.sigmoid(c)

    cat = jnp.concatenate([sa, ca], -1)
    tail = jnp.einsum("nhwc,cd->nhwd", cat, wt) + bt.reshape(1, 1, 1, -1)
    return x + tail


# --------------------------------------------------------------------------------- main ---

if __name__ == "__main__":
    N, C, H, W = 2, 8, 16, 16          # n_feat=8, reduction=2, ksize=3  ->  W*C = 128 lanes
    Cr = C // 2

    ks = jax.random.split(jax.random.PRNGKey(0), 13)

    params = {
        # conv1 / conv2 (3x3, reflect pad), HWIO
        "w1": jax.random.normal(ks[0], (3, 3, C, C), jnp.float32) * (2.0 / (9 * C)) ** 0.5,
        "b1": jax.random.normal(ks[1], (1, C), jnp.float32) * 0.05,
        "a1": jnp.full((1, C), 0.1, jnp.float32),                     # PReLU alpha
        "w2": jax.random.normal(ks[2], (3, 3, C, C), jnp.float32) * (1.0 / (9 * C)) ** 0.5,
        "b2": jax.random.normal(ks[3], (1, C), jnp.float32) * 0.05,
        # spatial attention conv (3x3, 2 -> 1)
        "wsp": jax.random.normal(ks[4], (3, 3, 2, 1), jnp.float32) * (2.0 / (9 * 3)) ** 0.5,
        "bsp": jax.random.normal(ks[5], (1, 1), jnp.float32) * 0.05,
        # channel attention 1x1 convs (stored as (Cin, Cout))
        "wc1": jax.random.normal(ks[6], (C, Cr), jnp.float32) * (2.0 / C) ** 0.5,
        "bc1": jax.random.normal(ks[7], (1, Cr), jnp.float32) * 0.05,
        "ac": jnp.full((1, Cr), 0.1, jnp.float32),                    # PReLU alpha
        "wc2": jax.random.normal(ks[8], (Cr, C), jnp.float32) * (2.0 / (Cr + C)) ** 0.5,
        "bc2": jax.random.normal(ks[9], (1, C), jnp.float32) * 0.05,
        # tail 1x1 conv (2C -> C), input order [sa channels, ca channels]
        "wt": jax.random.normal(ks[10], (2 * C, C), jnp.float32) * (2.0 / (3 * C)) ** 0.5,
        "bt": jax.random.normal(ks[11], (1, C), jnp.float32) * 0.05,
    }

    x = jax.random.normal(ks[12], (N, H, W, C), jnp.float32)

    consts = prepare_params(params, W, C)            # parameter preprocessing, done once
    fwd = jax.jit(dual_attention_block)
    out = jax.block_until_ready(fwd(x, consts))

    ref = jax.block_until_ready(ref_forward(x, params))
    assert out.shape == (N, H, W, C)
    err = float(jnp.abs(out - ref).max())
    assert jnp.allclose(out, ref, atol=1e-3, rtol=1e-3), err

    print("KERNEL_OK")
</pallas_src>

<mosaic_0001>
module attributes {stable_mosaic.version = 11 : i64} {
  func.func @kernel(%arg0: i32, %arg1: memref<1x16x128xf32, #tpu.memory_space<vmem>>, %arg2: memref<2048x128xf32, #tpu.memory_space<vmem>>, %arg3: memref<8x128xf32, #tpu.memory_space<vmem>>, %arg4: memref<1x16x128xf32, #tpu.memory_space<vmem>>) attributes {dimension_semantics = [#tpu.dimension_semantics<parallel>], iteration_bounds = array<i64: 2>, scalar_prefetch = 0 : i64, scratch_operands = 0 : i64, tpu.core_type = #tpu.core_type<tc>, window_params = [{transform_indices = @transform_0, window_bounds = array<i64: 1, 16, 128>}, {pipeline_mode = #tpu.pipeline_mode<synchronous>, transform_indices = @transform_1, window_bounds = array<i64: 2048, 128>}, {pipeline_mode = #tpu.pipeline_mode<synchronous>, transform_indices = @transform_2, window_bounds = array<i64: 8, 128>}, {transform_indices = @transform_3, window_bounds = array<i64: 1, 16, 128>}]} {
    %c0 = arith.constant 0 : index
    %c0_0 = arith.constant 0 : index
    %c0_1 = arith.constant 0 : index
    %0 = vector.load %arg1[%c0, %c0_0, %c0_1] : memref<1x16x128xf32, #tpu.memory_space<vmem>>, vector<1x16x128xf32>
    %1 = vector.shape_cast %0 : vector<1x16x128xf32> to vector<16x128xf32>
    %2 = vector.extract_strided_slice %1 {offsets = [1, 0], sizes = [1, 128], strides = [1, 1]} : vector<16x128xf32> to vector<1x128xf32>
    %3 = vector.extract_strided_slice %1 {offsets = [14, 0], sizes = [1, 128], strides = [1, 1]} : vector<16x128xf32> to vector<1x128xf32>
    %4 = tpu.concatenate %2, %1, %3 in 0 : vector<1x128xf32>, vector<16x128xf32>, vector<1x128xf32> -> vector<18x128xf32>
    %5 = vector.extract_strided_slice %4 {offsets = [0, 0], sizes = [16, 128], strides = [1, 1]} : vector<18x128xf32> to vector<16x128xf32>
    %c0_2 = arith.constant 0 : index
    %c0_3 = arith.constant 0 : index
    %6 = vector.load %arg2[%c0_2, %c0_3] : memref<2048x128xf32, #tpu.memory_space<vmem>>, vector<128x128xf32>
    %cst = arith.constant dense<0.000000e+00> : vector<16x128xf32>
    %7 = tpu.matmul %5, %6, %cst {dimension_numbers = #tpu.dot_dimension_numbers<[1], [0], [0], [1], [0, 0, 1, 1], [], []>} : vector<16x128xf32>, vector<128x128xf32>, vector<16x128xf32> -> vector<16x128xf32>
    %8 = vector.extract_strided_slice %4 {offsets = [1, 0], sizes = [16, 128], strides = [1, 1]} : vector<18x128xf32> to vector<16x128xf32>
    %c128 = arith.constant 128 : index
    %c0_4 = arith.constant 0 : index
    %9 = vector.load %arg2[%c128, %c0_4] : memref<2048x128xf32, #tpu.memory_space<vmem>>, vector<128x128xf32>
    %cst_5 = arith.constant dense<0.000000e+00> : vector<16x128xf32>
    %10 = tpu.matmul %8, %9, %cst_5 {dimension_numbers = #tpu.dot_dimension_numbers<[1], [0], [0], [1], [0, 0, 1, 1], [], []>} : vector<16x128xf32>, vector<128x128xf32>, vector<16x128xf32> -> vector<16x128xf32>
    %11 = arith.addf %7, %10 : vector<16x128xf32>
    %12 = vector.extract_strided_slice %4 {offsets = [2, 0], sizes = [16, 128], strides = [1, 1]} : vector<18x128xf32> to vector<16x128xf32>
    %c256 = arith.constant 256 : index
    %c0_6 = arith.constant 0 : index
    %13 = vector.load %arg2[%c256, %c0_6] : memref<2048x128xf32, #tpu.memory_space<vmem>>, vector<128x128xf32>
    %cst_7 = arith.constant dense<0.000000e+00> : vector<16x128xf32>
    %14 = tpu.matmul %12, %13, %cst_7 {dimension_numbers = #tpu.dot_dimension_numbers<[1], [0], [0], [1], [0, 0, 1, 1], [], []>} : vector<16x128xf32>, vector<128x128xf32>, vector<16x128xf32> -> vector<16x128xf32>
    %15 = arith.addf %11, %14 : vector<16x128xf32>
    %c0_8 = arith.constant 0 : index
    %c0_9 = arith.constant 0 : index
    %16 = vector.load %arg3[%c0_8, %c0_9] : memref<8x128xf32, #tpu.memory_space<vmem>>, vector<1x128xf32>
    %17 = vector.broadcast %16 : vector<1x128xf32> to vector<16x128xf32>
    %18 = arith.addf %15, %17 : vector<16x128xf32>
    %cst_10 = arith.constant 0.000000e+00 : f32
    %19 = vector.broadcast %cst_10 : f32 to vector<16x128xf32>
    %20 = arith.cmpf ogt, %18, %19 : vector<16x128xf32>
    %c1 = arith.constant 1 : index
    %c0_11 = arith.constant 0 : index
    %21 = vector.load %arg3[%c1, %c0_11] : memref<8x128xf32, #tpu.memory_space<vmem>>, vector<1x128xf32>
    %22 = vector.broadcast %21 : vector<1x128xf32> to vector<16x128xf32>
    %23 = arith.mulf %22, %18 : vector<16x128xf32>
    %24 = arith.select %20, %18, %23 : vector<16x128xi1>, vector<16x128xf32>
    %25 = vector.extract_strided_slice %24 {offsets = [1, 0], sizes = [1, 128], strides = [1, 1]} : vector<16x128xf32> to vector<1x128xf32>
    %26 = vector.extract_strided_slice %24 {offsets = [14, 0], sizes = [1, 128], strides = [1, 1]} : vector<16x128xf32> to vector<1x128xf32>
    %27 = tpu.concatenate %25, %24, %26 in 0 : vector<1x128xf32>, vector<16x128xf32>, vector<1x128xf32> -> vector<18x128xf32>
    %28 = vector.extract_strided_slice %27 {offsets = [0, 0], sizes = [16, 128], strides = [1, 1]} : vector<18x128xf32> to vector<16x128xf32>
    %c384 = arith.constant 384 : index
    %c0_12 = arith.constant 0 : index
    %29 = vector.load %arg2[%c384, %c0_12] : memref<2048x128xf32, #tpu.memory_space<vmem>>, vector<128x128xf32>
    %cst_13 = arith.constant dense<0.000000e+00> : vector<16x128xf32>
    %30 = tpu.matmul %28, %29, %cst_13 {dimension_numbers = #tpu.dot_dimension_numbers<[1], [0], [0], [1], [0, 0, 1, 1], [], []>} : vector<16x128xf32>, vector<128x128xf32>, vector<16x128xf32> -> vector<16x128xf32>
    %31 = vector.extract_strided_slice %27 {offsets = [1, 0], sizes = [16, 128], strides = [1, 1]} : vector<18x128xf32> to vector<16x128xf32>
    %c512 = arith.constant 512 : index
    %c0_14 = arith.constant 0 : index
    %32 = vector.load %arg2[%c512, %c0_14] : memref<2048x128xf32, #tpu.memory_space<vmem>>, vector<128x128xf32>
    %cst_15 = arith.constant dense<0.000000e+00> : vector<16x128xf32>
    %33 = tpu.matmul %31, %32, %cst_15 {dimension_numbers = #tpu.dot_dimension_numbers<[1], [0], [0], [1], [0, 0, 1, 1], [], []>} : vector<16x128xf32>, vector<128x128xf32>, vector<16x128xf32> -> vector<16x128xf32>
    %34 = arith.addf %30, %33 : vector<16x128xf32>
    %35 = vector.extract_strided_slice %27 {offsets = [2, 0], sizes = [16, 128], strides = [1, 1]} : vector<18x128xf32> to vector<16x128xf32>
    %c640 = arith.constant 640 : index
    %c0_16 = arith.constant 0 : index
    %36 = vector.load %arg2[%c640, %c0_16] : memref<2048x128xf32, #tpu.memory_space<vmem>>, vector<128x128xf32>
    %cst_17 = arith.constant dense<0.000000e+00> : vector<16x128xf32>
    %37 = tpu.matmul %35, %36, %cst_17 {dimension_numbers = #tpu.dot_dimension_numbers<[1], [0], [0], [1], [0, 0, 1, 1], [], []>} : vector<16x128xf32>, vector<128x128xf32>, vector<16x128xf32> -> vector<16x128xf32>
    %38 = arith.addf %34, %37 : vector<16x128xf32>
    %c2 = arith.constant 2 : index
    %c0_18 = arith.constant 0 : index
    %39 = vector.load %arg3[%c2, %c0_18] : memref<8x128xf32, #tpu.memory_space<vmem>>, vector<1x128xf32>
    %40 = vector.broadcast %39 : vector<1x128xf32> to vector<16x128xf32>
    %41 = arith.addf %38, %40 : vector<16x128xf32>
    %c16_i32 = arith.constant 16 : i32
    %42 = tpu.dynamic_rotate %41 by %c16_i32 dim 1 : vector<16x128xf32>, i32 -> vector<16x128xf32>
    %43 = arith.maximumf %41, %42 : vector<16x128xf32>
    %c32_i32 = arith.constant 32 : i32
    %44 = tpu.dynamic_rotate %43 by %c32_i32 dim 1 : vector<16x128xf32>, i32 -> vector<16x128xf32>
    %45 = arith.maximumf %43, %44 : vector<16x128xf32>
    %c64_i32 = arith.constant 64 : i32
    %46 = tpu.dynamic_rotate %45 by %c64_i32 dim 1 : vector<16x128xf32>, i32 -> vector<16x128xf32>
    %47 = arith.maximumf %45, %46 : vector<16x128xf32>
    %c16_i32_19 = arith.constant 16 : i32
    %48 = tpu.dynamic_rotate %41 by %c16_i32_19 dim 1 : vector<16x128xf32>, i32 -> vector<16x128xf32>
    %49 = arith.addf %41, %48 : vector<16x128xf32>
    %c32_i32_20 = arith.constant 32 : i32
    %50 = tpu.dynamic_rotate %49 by %c32_i32_20 dim 1 : vector<16x128xf32>, i32 -> vector<16x128xf32>
    %51 = arith.addf %49, %50 : vector<16x128xf32>
    %c64_i32_21 = arith.constant 64 : i32
    %52 = tpu.dynamic_rotate %51 by %c64_i32_21 dim 1 : vector<16x128xf32>, i32 -> vector<16x128xf32>
    %53 = arith.addf %51, %52 : vector<16x128xf32>
    %cst_22 = arith.constant 1.250000e-01 : f32
    %54 = vector.broadcast %cst_22 : f32 to vector<16x128xf32>
    %55 = arith.mulf %53, %54 : vector<16x128xf32>
    %56 = vector.extract_strided_slice %55 {offsets = [1, 0], sizes = [1, 128], strides = [1, 1]} : vector<16x128xf32> to vector<1x128xf32>
    %57 = vector.extract_strided_slice %55 {offsets = [14, 0], sizes = [1, 128], strides = [1, 1]} : vector<16x128xf32> to vector<1x128xf32>
    %58 = tpu.concatenate %56, %55, %57 in 0 : vector<1x128xf32>, vector<16x128xf32>, vector<1x128xf32> -> vector<18x128xf32>
    %59 = vector.extract_strided_slice %47 {offsets = [1, 0], sizes = [1, 128], strides = [1, 1]} : vector<16x128xf32> to vector<1x128xf32>
    %60 = vector.extract_strided_slice %47 {offsets = [14, 0], sizes = [1, 128], strides = [1, 1]} : vector<16x128xf32> to vector<1x128xf32>
    %61 = tpu.concatenate %59, %47, %60 in 0 : vector<1x128xf32>, vector<16x128xf32>, vector<1x128xf32> -> vector<18x128xf32>
    %62 = vector.extract_strided_slice %58 {offsets = [0, 0], sizes = [16, 128], strides = [1, 1]} : vector<18x128xf32> to vector<16x128xf32>
    %c768 = arith.constant 768 : index
    %c0_23 = arith.constant 0 : index
    %63 = vector.load %arg2[%c768, %c0_23] : memref<2048x128xf32, #tpu.memory_space<vmem>>, vector<128x128xf32>
    %cst_24 = arith.constant dense<0.000000e+00> : vector<16x128xf32>
    %64 = tpu.matmul %62, %63, %cst_24 {dimension_numbers = #tpu.dot_dimension_numbers<[1], [0], [0], [1], [0, 0, 1, 1], [], []>} : vector<16x128xf32>, vector<128x128xf32>, vector<16x128xf32> -> vector<16x128xf32>
    %65 = vector.extract_strided_slice %61 {offsets = [0, 0], sizes = [16, 128], strides = [1, 1]} : vector<18x128xf32> to vector<16x128xf32>
    %c896 = arith.constant 896 : index
    %c0_25 = arith.constant 0 : index
    %66 = vector.load %arg2[%c896, %c0_25] : memref<2048x128xf32, #tpu.memory_space<vmem>>, vector<128x128xf32>
    %cst_26 = arith.constant dense<0.000000e+00> : vector<16x128xf32>
    %67 = tpu.matmul %65, %66, %cst_26 {dimension_numbers = #tpu.dot_dimension_numbers<[1], [0], [0], [1], [0, 0, 1, 1], [], []>} : vector<16x128xf32>, vector<128x128xf32>, vector<16x128xf32> -> vector<16x128xf32>
    %68 = arith.addf %64, %67 : vector<16x128xf32>
    %69 = vector.extract_strided_slice %58 {offsets = [1, 0], sizes = [16, 128], strides = [1, 1]} : vector<18x128xf32> to vector<16x128xf32>
    %c1024 = arith.constant 1024 : index
    %c0_27 = arith.constant 0 : index
    %70 = vector.load %arg2[%c1024, %c0_27] : memref<2048x128xf32, #tpu.memory_space<vmem>>, vector<128x128xf32>
    %cst_28 = arith.constant dense<0.000000e+00> : vector<16x128xf32>
    %71 = tpu.matmul %69, %70, %cst_28 {dimension_numbers = #tpu.dot_dimension_numbers<[1], [0], [0], [1], [0, 0, 1, 1], [], []>} : vector<16x128xf32>, vector<128x128xf32>, vector<16x128xf32> -> vector<16x128xf32>
    %72 = arith.addf %68, %71 : vector<16x128xf32>
    %73 = vector.extract_strided_slice %61 {offsets = [1, 0], sizes = [16, 128], strides = [1, 1]} : vector<18x128xf32> to vector<16x128xf32>
    %c1152 = arith.constant 1152 : index
    %c0_29 = arith.constant 0 : index
    %74 = vector.load %arg2[%c1152, %c0_29] : memref<2048x128xf32, #tpu.memory_space<vmem>>, vector<128x128xf32>
    %cst_30 = arith.constant dense<0.000000e+00> : vector<16x128xf32>
    %75 = tpu.matmul %73, %74, %cst_30 {dimension_numbers = #tpu.dot_dimension_numbers<[1], [0], [0], [1], [0, 0, 1, 1], [], []>} : vector<16x128xf32>, vector<128x128xf32>, vector<16x128xf32> -> vector<16x128xf32>
    %76 = arith.addf %72, %75 : vector<16x128xf32>
    %77 = vector.extract_strided_slice %58 {offsets = [2, 0], sizes = [16, 128], strides = [1, 1]} : vector<18x128xf32> to vector<16x128xf32>
    %c1280 = arith.constant 1280 : index
    %c0_31 = arith.constant 0 : index
    %78 = vector.load %arg2[%c1280, %c0_31] : memref<2048x128xf32, #tpu.memory_space<vmem>>, vector<128x128xf32>
    %cst_32 = arith.constant dense<0.000000e+00> : vector<16x128xf32>
    %79 = tpu.matmul %77, %78, %cst_32 {dimension_numbers = #tpu.dot_dimension_numbers<[1], [0], [0], [1], [0, 0, 1, 1], [], []>} : vector<16x128xf32>, vector<128x128xf32>, vector<16x128xf32> -> vector<16x128xf32>
    %80 = arith.addf %76, %79 : vector<16x128xf32>
    %81 = vector.extract_strided_slice %61 {offsets = [2, 0], sizes = [16, 128], strides = [1, 1]} : vector<18x128xf32> to vector<16x128xf32>
    %c1408 = arith.constant 1408 : index
    %c0_33 = arith.constant 0 : index
    %82 = vector.load %arg2[%c1408, %c0_33] : memref<2048x128xf32, #tpu.memory_space<vmem>>, vector<128x128xf32>
    %cst_34 = arith.constant dense<0.000000e+00> : vector<16x128xf32>
    %83 = tpu.matmul %81, %82, %cst_34 {dimension_numbers = #tpu.dot_dimension_numbers<[1], [0], [0], [1], [0, 0, 1, 1], [], []>} : vector<16x128xf32>, vector<128x128xf32>, vector<16x128xf32> -> vector<16x128xf32>
    %84 = arith.addf %80, %83 : vector<16x128xf32>
    %c4 = arith.constant 4 : index
    %c0_35 = arith.constant 0 : index
    %85 = vector.load %arg3[%c4, %c0_35] : memref<8x128xf32, #tpu.memory_space<vmem>>, vector<1x128xf32>
    %86 = vector.broadcast %85 : vector<1x128xf32> to vector<16x128xf32>
    %87 = arith.addf %84, %86 : vector<16x128xf32>
    %88 = arith.negf %87 : vector<16x128xf32>
    %89 = math.exp %88 : vector<16x128xf32>
    %cst_36 = arith.constant 1.000000e+00 : f32
    %90 = vector.broadcast %cst_36 : f32 to vector<16x128xf32>
    %91 = arith.addf %90, %89 : vector<16x128xf32>
    %92 = arith.divf %90, %91 : vector<16x128xf32>
    %93 = arith.mulf %41, %92 : vector<16x128xf32>
    %cst_37 = arith.constant dense<0.000000e+00> : vector<128xf32>
    %94 = vector.multi_reduction <add>, %41, %cst_37 [0] : vector<16x128xf32> to vector<128xf32>
    %95 = vector.shape_cast %94 : vector<128xf32> to vector<1x128xf32>
    %cst_38 = arith.constant 1.600000e+01 : f32
    %96 = vector.broadcast %cst_38 : f32 to vector<1x128xf32>
    %97 = arith.divf %95, %96 : vector<1x128xf32>
    %c1792 = arith.constant 1792 : index
    %c0_39 = arith.constant 0 : index
    %98 = vector.load %arg2[%c1792, %c0_39] : memref<2048x128xf32, #tpu.memory_space<vmem>>, vector<128x128xf32>
    %cst_40 = arith.constant dense<0.000000e+00> : vector<1x128xf32>
    %99 = tpu.matmul %97, %98, %cst_40 {dimension_numbers = #tpu.dot_dimension_numbers<[1], [0], [0], [1], [0, 0, 1, 1], [], []>} : vector<1x128xf32>, vector<128x128xf32>, vector<1x128xf32> -> vector<1x128xf32>
    %c6 = arith.constant 6 : index
    %c0_41 = arith.constant 0 : index
    %100 = vector.load %arg3[%c6, %c0_41] : memref<8x128xf32, #tpu.memory_space<vmem>>, vector<1x128xf32>
    %101 = arith.addf %99, %100 : vector<1x128xf32>
    %cst_42 = arith.constant 0.000000e+00 : f32
    %102 = vector.broadcast %cst_42 : f32 to vector<1x128xf32>
    %103 = arith.cmpf ogt, %101, %102 : vector<1x128xf32>
    %c7 = arith.constant 7 : index
    %c0_43 = arith.constant 0 : index
    %104 = vector.load %arg3[%c7, %c0_43] : memref<8x128xf32, #tpu.memory_space<vmem>>, vector<1x128xf32>
    %105 = arith.mulf %104, %101 : vector<1x128xf32>
    %106 = arith.select %103, %101, %105 : vector<1x128xi1>, vector<1x128xf32>
    %c1920 = arith.constant 1920 : index
    %c0_44 = arith.constant 0 : index
    %107 = vector.load %arg2[%c1920, %c0_44] : memref<2048x128xf32, #tpu.memory_space<vmem>>, vector<128x128xf32>
    %cst_45 = arith.constant dense<0.000000e+00> : vector<1x128xf32>
    %108 = tpu.matmul %106, %107, %cst_45 {dimension_numbers = #tpu.dot_dimension_numbers<[1], [0], [0], [1], [0, 0, 1, 1], [], []>} : vector<1x128xf32>, vector<128x128xf32>, vector<1x128xf32> -> vector<1x128xf32>
    %c5 = arith.constant 5 : index
    %c0_46 = arith.constant 0 : index
    %109 = vector.load %arg3[%c5, %c0_46] : memref<8x128xf32, #tpu.memory_space<vmem>>, vector<1x128xf32>
    %110 = arith.addf %108, %109 : vector<1x128xf32>
    %111 = arith.negf %110 : vector<1x128xf32>
    %112 = math.exp %111 : vector<1x128xf32>
    %cst_47 = arith.constant 1.000000e+00 : f32
    %113 = vector.broadcast %cst_47 : f32 to vector<1x128xf32>
    %114 = arith.addf %113, %112 : vector<1x128xf32>
    %115 = arith.divf %113, %114 : vector<1x128xf32>
    %116 = vector.broadcast %115 : vector<1x128xf32> to vector<16x128xf32>
    %117 = arith.mulf %41, %116 : vector<16x128xf32>
    %c1536 = arith.constant 1536 : index
    %c0_48 = arith.constant 0 : index
    %118 = vector.load %arg2[%c1536, %c0_48] : memref<2048x128xf32, #tpu.memory_space<vmem>>, vector<128x128xf32>
    %cst_49 = arith.constant dense<0.000000e+00> : vector<16x128xf32>
    %119 = tpu.matmul %93, %118, %cst_49 {dimension_numbers = #tpu.dot_dimension_numbers<[1], [0], [0], [1], [0, 0, 1, 1], [], []>} : vector<16x128xf32>, vector<128x128xf32>, vector<16x128xf32> -> vector<16x128xf32>
    %c1664 = arith.constant 1664 : index
    %c0_50 = arith.constant 0 : index
    %120 = vector.load %arg2[%c1664, %c0_50] : memref<2048x128xf32, #tpu.memory_space<vmem>>, vector<128x128xf32>
    %cst_51 = arith.constant dense<0.000000e+00> : vector<16x128xf32>
    %121 = tpu.matmul %117, %120, %cst_51 {dimension_numbers = #tpu.dot_dimension_numbers<[1], [0], [0], [1], [0, 0, 1, 1], [], []>} : vector<16x128xf32>, vector<128x128xf32>, vector<16x128xf32> -> vector<16x128xf32>
    %122 = arith.addf %119, %121 : vector<16x128xf32>
    %c3 = arith.constant 3 : index
    %c0_52 = arith.constant 0 : index
    %123 = vector.load %arg3[%c3, %c0_52] : memref<8x128xf32, #tpu.memory_space<vmem>>, vector<1x128xf32>
    %124 = vector.broadcast %123 : vector<1x128xf32> to vector<16x128xf32>
    %125 = arith.addf %122, %124 : vector<16x128xf32>
    %126 = arith.addf %1, %125 : vector<16x128xf32>
    %c0_53 = arith.constant 0 : index
    %c0_54 = arith.constant 0 : index
    %c0_55 = arith.constant 0 : index
    %127 = vector.load %arg4[%c0_53, %c0_54, %c0_55] : memref<1x16x128xf32, #tpu.memory_space<vmem>>, vector<1x16x128xf32>
    %128 = vector.shape_cast %127 : vector<1x16x128xf32> to vector<16x128xf32>
    %129 = vector.shape_cast %126 : vector<16x128xf32> to vector<1x16x128xf32>
    tpu.vector_store %arg4[%c0_53, %c0_54, %c0_55], %129 {strides = array<i32>} : memref<1x16x128xf32, #tpu.memory_space<vmem>>, vector<1x16x128xf32>,
    return
  }
  func.func @transform_0(%arg0: i32) -> (i32, i32, i32) {
    %c0_i32 = arith.constant 0 : i32
    %c0_i32_0 = arith.constant 0 : i32
    %c0_i32_1 = arith.constant 0 : i32
    return %arg0, %c0_i32, %c0_i32_0 : i32, i32, i32
  }
  func.func @transform_1(%arg0: i32) -> (i32, i32) {
    %c0_i32 = arith.constant 0 : i32
    %c0_i32_0 = arith.constant 0 : i32
    %c0_i32_1 = arith.constant 0 : i32
    return %c0_i32, %c0_i32_0 : i32, i32
  }
  func.func @transform_2(%arg0: i32) -> (i32, i32) {
    %c0_i32 = arith.constant 0 : i32
    %c0_i32_0 = arith.constant 0 : i32
    %c0_i32_1 = arith.constant 0 : i32
    return %c0_i32, %c0_i32_0 : i32, i32
  }
  func.func @transform_3(%arg0: i32) -> (i32, i32, i32) {
    %c0_i32 = arith.constant 0 : i32
    %c0_i32_0 = arith.constant 0 : i32
    %c0_i32_1 = arith.constant 0 : i32
    return %arg0, %c0_i32, %c0_i32_0 : i32, i32, i32
  }
}

</mosaic_0001>

<bundles_post_ra>
// kernel: dual_attention_block.1
= control target key start
LH: loop header
LB: loop body
LE: loop exit
PB: predicated region body
PF: predicated region fallthrough
CT: control target
= control target key end

     0   :  { %8 = vsyncpa [#allocation3], 0  ;;  %s2939_s12 = smov 0   ;;  %s3191_s0 = inlined_call_operand.vmem [shape: f32[2,16,128], index: 0, kind: input, shape index: {}]   ;;  %s3192_s1 = inlined_call_operand.hbm [shape: f32[2048,128], index: 1, kind: input, shape index: {}]   ;;  %s3193_s2 = inlined_call_operand.vmem [shape: f32[8,128], index: 2, kind: input, shape index: {}]   ;;  %s3194_s3 = inlined_call_operand.vmem [shape: f32[2,16,128], index: 3, kind: output, shape index: {}]  }
   0x1 LB: > { %s2945_s13 = sadd.s32 4294967295, %s2909_s12   ;;  %p1956_p0 = scmp.ge.s32.totalorder %s2909_s12, 1  ;;  %s2909_s12 = sphi %s2939_s12, %s14_s12  }
   0x2   : > { %p113_p1 = scmp.lt.s32.totalorder %s2909_s12, 3  ;;  %s2911_s14 = smov [#allocation2]  }
   0x3   : > { %s125_s15 = sshll.u32 %s2911_s14, 4  ;;  %p2831_p3 = scmp.eq.s32.totalorder %s2945_s13, 0  ;;  %s126_s15 = int_to_ptr.vmem [resolvable:$true] %s125_s15 }
   0x4   : > { %p2949_p2 = pnand %p1956_p0, %p113_p1  ;;  %s2884_s17 = scalar_lea.vmem %s126_s15, 32768 }
   0x5   : > { %p2885_p7 = scmp.ne.s32.totalorder %s126_s15, %s2884_s17  ;;  %p2892_p10 = scmp.lt.s32.totalorder %s126_s15, %s126_s15 }
   0x6   : > { %p2827_p4 = pneg %p2949_p2  ;;  %p2893_p11 = scmp.lt.s32.totalorder %s2884_s17, %s2884_s17 }
   0x8   : > { %p2828_p5 = pnand %p2831_p3, %p2827_p4  ;;  %p2894_p12 = por %p2893_p11, %p2892_p10 }
   0xa   : > { %p2875_p6 = pneg %p2828_p5 }
   0xc   : > { %p2887_p8 = pnand %p2885_p7, %p2875_p6 }
   0xe   : > { %p2888_p9 = pneg %p2887_p8 }
  0x10   : > { %p2895_p13 = pnand %p2894_p12, %p2888_p9 }
  0x12   : > { %2898 = shalt.err (!%p2895_p13)
}
  0x13   : > { %s2912_s18 = smov 128   ;;  %s2913_s19 = smov 8  }
  0x14   : > { %2830 = dma.hbm_to_vmem [thread:$0]  (!%p2828_p5), %s3192_s1, 32768, %s126_s15, [#allocation3], %s2912_s18, %s2912_s18, %s2913_s19  }
  0x15   : > { %152 = sbr.rel (%p2949_p2) target bundleno = 1634 (0x662), region = 32 }
  0x1a   : > { %2904 = dma.done.wait (%p2831_p3), [#allocation3], 32768  }
  0x1b   : > { %2906 = vsyncadd (%p2831_p3), [#allocation3], 4294934528  ;;  %v234_v0 = vld [vmem:[#allocation2 + $0xf8] sm:$0xff]  ;;  %v233_v2 = vld [vmem:[#allocation2 + $0xf0] sm:$0xff]  ;;  %p176_p0 = scmp.lt.s32.totalorder %s2945_s13, 1  ;;  %vm192_vm0 = vcmask 1040384  }
  0x1c   : > { %v218_v1 = vld [vmem:[#allocation2 + $0x78] sm:$0xff]  ;;  %2263 = vmatprep.subr.mxu0 %v234_v0  ;;  %v217_v3 = vld [vmem:[#allocation2 + $0x70] sm:$0xff]  ;;  %v232_v4 = vld [vmem:[#allocation2 + $0xe8] sm:$0xff]  ;;  %vm237_vm1 = vcmask 1046528   ;;  %vm411_vm2 = vcmask 1045504   ;;  %s2914_s5 = smov 16  }
  0x1d   : > { %2298 = vmatprep.subr.mxu1 %v218_v1  ;;  %2264 = vmatpush3.msra.mxu0 %v234_v0  ;;  %v216_v5 = vld [vmem:[#allocation2 + $0x68] sm:$0xff]  ;;  %v231_v6 = vld [vmem:[#allocation2 + $0xe0] sm:$0xff]  ;;  %s3197_s13 = smov (!%p176_p0, %s2945_s13), 1  ;;  %v230_v8 = vld [vmem:[#allocation2 + $0xd8] sm:$0xff]  ;;  %s2915_s6 = smov 32   ;;  %vm2918_vm5 = vmmov 0  }
  0x1e   : > { %2299 = vmatpush3.msra.mxu1 %v218_v1  ;;  %2265 = vmatprep.subr.mxu0 %v233_v2  ;;  %v215_v7 = vld [vmem:[#allocation2 + $0x60] sm:$0xff]  ;;  %v214_v9 = vld [vmem:[#allocation2 + $0x58] sm:$0xff]  ;;  %v229_v10 = vld [vmem:[#allocation2 + $0xd0] sm:$0xff]  ;;  %s1975_s22 = sshll.u32 %s3197_s13, 4  ;;  %s2916_s7 = smov 64  }
  0x1f   : > { %2300 = vmatprep.subr.mxu1 %v217_v3  ;;  %2266 = vmatpush3.msra.mxu0 %v233_v2  ;;  %v213_v11 = vld [vmem:[#allocation2 + $0x50] sm:$0xff]  ;;  %v228_v12 = vld [vmem:[#allocation2 + $0xc8] sm:$0xff]  ;;  %v227_v14 = vld [vmem:[#allocation2 + $0xc0] sm:$0xff]  ;;  %s2977_s25 = scalar_lea.vmem %s3191_s0, %s1975_s22  ;;  %s185_s23 = scalar_lea.vmem %s3194_s3, %s1975_s22 }
  0x20   : > { %2301 = vmatpush3.msra.mxu1 %v217_v3  ;;  %2267 = vmatprep.subr.mxu0 %v232_v4  ;;  %v212_v13 = vld [vmem:[#allocation2 + $0x48] sm:$0xff]  ;;  %v211_v15 = vld [vmem:[#allocation2 + $0x40] sm:$0xff]  ;;  %v226_v16 = vld [vmem:[#allocation2 + $0xb8] sm:$0xff] }
  0x21   : > { %2302 = vmatprep.subr.mxu1 %v216_v5  ;;  %2268 = vmatpush3.msra.mxu0 %v232_v4  ;;  %v210_v17 = vld [vmem:[#allocation2 + $0x38] sm:$0xff]  ;;  %v186_v18 = vld [vmem:[%s2977_s25] sm:$0xff]  ;;  %v187_v19 = vld [vmem:[%s2977_s25 + $0x8] sm:$0xff] }
  0x22   : > { %2303 = vmatpush3.msra.mxu1 %v216_v5  ;;  %2269 = vmatprep.subr.mxu0 %v231_v6  ;;  %v225_v20 = vld [vmem:[#allocation2 + $0xb0] sm:$0xff]  ;;  %v224_v22 = vld [vmem:[#allocation2 + $0xa8] sm:$0xff]  ;;  %v189_v24 = vrot.slane %v186_v18, 1  ;;  %v193_v25 = vrot.slane %v186_v18, 7  ;;  %v194_v26 = vrot.slane %v187_v19, 7  ;;  %v223_v27 = vld [vmem:[#allocation2 + $0xa0] sm:$0xff] }
  0x23   : > { %2304 = vmatprep.subr.mxu1 %v215_v7  ;;  %2270 = vmatpush3.msra.mxu0 %v231_v6  ;;  %v209_v21 = vld [vmem:[#allocation2 + $0x30] sm:$0xff]  ;;  %v208_v23 = vld [vmem:[#allocation2 + $0x28] sm:$0xff]  ;;  %v207_v28 = vld [vmem:[#allocation2 + $0x20] sm:$0xff]  ;;  %v199_v29 = vrot.slane %v187_v19, 5 }
  0x24   : > { %2305 = vmatpush3.msra.mxu1 %v215_v7  ;;  %2271 = vmatprep.subr.mxu0 %v230_v8  ;;  %v222_v30 = vld [vmem:[#allocation2 + $0x98] sm:$0xff]  ;;  %v2982_v32 = vsel %vm192_vm0, %v193_v25, %v194_v26  ;;  %v201_v33 = vsel %vm192_vm0, %v189_v24, %v193_v25  ;;  %v221_v34 = vld [vmem:[#allocation2 + $0x90] sm:$0xff]  ;;  %v220_v39 = vld [vmem:[#allocation2 + $0x88] sm:$0xff] }
  0x25   : > { %2306 = vmatprep.subr.mxu1 %v214_v9  ;;  %2272 = vmatpush3.msra.mxu0 %v230_v8  ;;  %v206_v31 = vld [vmem:[#allocation2 + $0x18] sm:$0xff]  ;;  %v205_v35 = vld [vmem:[#allocation2 + $0x10] sm:$0xff]  ;;  %v2986_v36 = vsel %vm192_vm0, %v194_v26, %v199_v29  ;;  %v238_v37 = vrot.slane %v201_v33, 1  ;;  %v239_v38 = vrot.slane %v2982_v32, 1  ;;  %v204_v40 = vld [vmem:[#allocation2 + $0x8] sm:$0xff]  ;;  %v412_v44 = vrot.slane %v201_v33, 2 }
  0x26   : > { %2307 = vmatpush3.msra.mxu1 %v214_v9  ;;  %2273 = vmatprep.subr.mxu0 %v229_v10  ;;  %v241_v41 = vrot.slane %v2986_v36, 1  ;;  %v219_v42 = vld [vmem:[#allocation2 + $0x80] sm:$0xff]  ;;  %v413_v45 = vrot.slane %v2982_v32, 2  ;;  %v410_v48 = vld [vmem:[#allocation2 + $0x178] sm:$0xff]  ;;  %v409_v50 = vld [vmem:[#allocation2 + $0x170] sm:$0xff]  ;;  %v415_v0 = vrot.slane %v2986_v36, 2 }
  0x27   : > { %2308 = vmatprep.subr.mxu1 %v213_v11  ;;  %2274 = vmatpush3.msra.mxu0 %v229_v10  ;;  %v203_v43 = vld [vmem:[#allocation2] sm:$0xff]  ;;  %v240_v46 = vsel %vm237_vm1, %v238_v37, %v239_v38  ;;  %v408_v51 = vld [vmem:[#allocation2 + $0x168] sm:$0xff]  ;;  %v406_v53 = vld [vmem:[#allocation2 + $0x158] sm:$0xff] }
  0x28   : > { %2309 = vmatpush3.msra.mxu1 %v213_v11  ;;  %2275 = vmatprep.subr.mxu0 %v228_v12  ;;  %v242_v47 = vsel %vm237_vm1, %v239_v38, %v241_v41  ;;  %v414_v49 = vsel %vm411_vm2, %v412_v44, %v413_v45  ;;  %v407_v52 = vld [vmem:[#allocation2 + $0x160] sm:$0xff]  ;;  %v405_v54 = vld [vmem:[#allocation2 + $0x150] sm:$0xff]  ;;  %v404_v55 = vld [vmem:[#allocation2 + $0x148] sm:$0xff]  ;;  %v416_v2 = vsel %vm411_vm2, %v413_v45, %v415_v0 }
  0x29   : > { %2310 = vmatprep.subr.mxu1 %v212_v13  ;;  %2276 = vmatpush3.msra.mxu0 %v228_v12  ;;  %v403_v56 = vld [vmem:[#allocation2 + $0x140] sm:$0xff]  ;;  %v402_v57 = vld [vmem:[#allocation2 + $0x138] sm:$0xff]  ;;  %v401_v58 = vld [vmem:[#allocation2 + $0x130] sm:$0xff] }
  0x2a   : > { %2311 = vmatpush3.msra.mxu1 %v212_v13  ;;  %2277 = vmatprep.subr.mxu0 %v227_v14  ;;  %v400_v59 = vld [vmem:[#allocation2 + $0x128] sm:$0xff]  ;;  %v399_v60 = vld [vmem:[#allocation2 + $0x120] sm:$0xff]  ;;  %v398_v61 = vld [vmem:[#allocation2 + $0x118] sm:$0xff] }
  0x2b   : > { %2312 = vmatprep.subr.mxu1 %v211_v15  ;;  %2278 = vmatpush3.msra.mxu0 %v227_v14  ;;  %v397_v62 = vld [vmem:[#allocation2 + $0x110] sm:$0xff]  ;;  %v396_v63 = vld [vmem:[#allocation2 + $0x108] sm:$0xff]  ;;  %v395_v1 = vld [vmem:[#allocation2 + $0x100] sm:$0xff] }
  0x2c   : > { %2313 = vmatpush3.msra.mxu1 %v211_v15  ;;  %2279 = vmatprep.subr.mxu0 %v226_v16  ;;  %v543_v3 = vld [vmem:[#allocation2 + $0x1f8] sm:$0xff]  ;;  %v542_v5 = vld [vmem:[#allocation2 + $0x1f0] sm:$0xff]  ;;  %v541_v7 = vld [vmem:[#allocation2 + $0x1e8] sm:$0xff] }
  0x2d   : > { %2314 = vmatprep.subr.mxu1 %v210_v17  ;;  %2280 = vmatpush3.msra.mxu0 %v226_v16  ;;  %v559_v4 = vld [vmem:[#allocation2 + $0x278] sm:$0xff]  ;;  %v558_v6 = vld [vmem:[#allocation2 + $0x270] sm:$0xff]  ;;  %v557_v8 = vld [vmem:[#allocation2 + $0x268] sm:$0xff] }
  0x2e   : > { %2315 = vmatpush3.msra.mxu1 %v210_v17  ;;  %2281 = vmatprep.subr.mxu0 %v225_v20  ;;  %v540_v9 = vld [vmem:[#allocation2 + $0x1e0] sm:$0xff]  ;;  %v539_v11 = vld [vmem:[#allocation2 + $0x1d8] sm:$0xff]  ;;  %v538_v13 = vld [vmem:[#allocation2 + $0x1d0] sm:$0xff] }
  0x2f   : > { %2316 = vmatprep.subr.mxu1 %v209_v21  ;;  %2282 = vmatpush3.msra.mxu0 %v225_v20  ;;  %v556_v10 = vld [vmem:[#allocation2 + $0x260] sm:$0xff]  ;;  %v555_v12 = vld [vmem:[#allocation2 + $0x258] sm:$0xff]  ;;  %v554_v14 = vld [vmem:[#allocation2 + $0x250] sm:$0xff] }
  0x30   : > { %2317 = vmatpush3.msra.mxu1 %v209_v21  ;;  %2283 = vmatprep.subr.mxu0 %v224_v22  ;;  %v537_v15 = vld [vmem:[#allocation2 + $0x1c8] sm:$0xff]  ;;  %v536_v17 = vld [vmem:[#allocation2 + $0x1c0] sm:$0xff]  ;;  %v535_v19 = vld [vmem:[#allocation2 + $0x1b8] sm:$0xff] }
  0x31   : > { %2318 = vmatprep.subr.mxu1 %v208_v23  ;;  %2284 = vmatpush3.msra.mxu0 %v224_v22  ;;  %v553_v16 = vld [vmem:[#allocation2 + $0x248] sm:$0xff]  ;;  %v552_v18 = vld [vmem:[#allocation2 + $0x240] sm:$0xff]  ;;  %v551_v20 = vld [vmem:[#allocation2 + $0x238] sm:$0xff] }
  0x32   : > { %2319 = vmatpush3.msra.mxu1 %v208_v23  ;;  %2285 = vmatprep.subr.mxu0 %v223_v27  ;;  %v534_v21 = vld [vmem:[#allocation2 + $0x1b0] sm:$0xff]  ;;  %v533_v23 = vld [vmem:[#allocation2 + $0x1a8] sm:$0xff]  ;;  %v532_v25 = vld [vmem:[#allocation2 + $0x1a0] sm:$0xff] }
  0x33   : > { %2320 = vmatprep.subr.mxu1 %v207_v28  ;;  %2286 = vmatpush3.msra.mxu0 %v223_v27  ;;  %v550_v22 = vld [vmem:[#allocation2 + $0x230] sm:$0xff]  ;;  %v549_v24 = vld [vmem:[#allocation2 + $0x228] sm:$0xff]  ;;  %v548_v26 = vld [vmem:[#allocation2 + $0x220] sm:$0xff] }
  0x34   : > { %2321 = vmatpush3.msra.mxu1 %v207_v28  ;;  %2287 = vmatprep.subr.mxu0 %v222_v30  ;;  %v531_v27 = vld [vmem:[#allocation2 + $0x198] sm:$0xff]  ;;  %v530_v29 = vld [vmem:[#allocation2 + $0x190] sm:$0xff]  ;;  %v1966_v45 = vld [vmem:[%s3193_s2 + $0x1] ss:$0 sm:$0xff] }
  0x35   : > { %2322 = vmatprep.subr.mxu1 %v206_v31  ;;  %2288 = vmatpush3.msra.mxu0 %v222_v30  ;;  %v547_v28 = vld [vmem:[#allocation2 + $0x218] sm:$0xff]  ;;  %v546_v30 = vld [vmem:[#allocation2 + $0x210] sm:$0xff] }
  0x36   : > { %2323 = vmatpush3.msra.mxu1 %v206_v31  ;;  %2289 = vmatprep.subr.mxu0 %v221_v34  ;;  %v529_v31 = vld [vmem:[#allocation2 + $0x188] sm:$0xff] }
  0x37   : > { %2324 = vmatprep.subr.mxu1 %v205_v35  ;;  %2290 = vmatpush3.msra.mxu0 %v221_v34  ;;  %v544_v34 = vld [vmem:[#allocation2 + $0x200] sm:$0xff] }
  0x38   : > { %2325 = vmatpush3.msra.mxu1 %v205_v35  ;;  %2291 = vmatprep.subr.mxu0 %v220_v39  ;;  %v734_v35 = vld [vmem:[#allocation2 + $0x2f8] sm:$0xff] }
  0x39   : > { %2326 = vmatprep.subr.mxu1 %v204_v40  ;;  %2292 = vmatpush3.msra.mxu0 %v220_v39 }
  0x3a   : > { %2327 = vmatpush3.msra.mxu1 %v204_v40  ;;  %2293 = vmatprep.subr.mxu0 %v219_v42 }
  0x3b   : > { %2328 = vmatprep.subr.mxu1 %v203_v43  ;;  %2294 = vmatpush3.msra.mxu0 %v219_v42  ;;  %v1965_v42 = vld [vmem:[%s3193_s2] ss:$0 sm:$0xff] }
  0x3c   : > { %2295 = vmatprep.mubr.f32.mxu0 %v240_v46  ;;  %2329 = vmatpush3.msra.mxu1 %v203_v43 }
  0x3d   : > { %2330 = vmatprep.mubr.f32.mxu1 %v201_v33  ;;  %2296 = vmatmul.mubr.f32.vlgmr.msra.gmra.mxu0 %v242_v47  ;;  %v528_v33 = vld [vmem:[#allocation2 + $0x180] sm:$0xff] }
  0x3e   : > { %2331 = vmatmul.mubr.f32.vlgmr.msra.gmra.mxu1 %v2982_v32  ;;  %2333 = vmatprep.subr.mxu0 %v410_v48  ;;  %v545_v32 = vld [vmem:[#allocation2 + $0x208] sm:$0xff] }
  0x3f   : > { %2365 = vmatprep.mubr.f32.mxu0 %v414_v49  ;;  %2334 = vmatpush3.msra.mxu0 %v410_v48 }
  0x40   : > { %2335 = vmatprep.subr.mxu0 %v409_v50  ;;  %2368 = vmatprep.subr.mxu1 %v559_v4 }
  0x41   : > { %2336 = vmatpush3.msra.mxu0 %v409_v50  ;;  %2369 = vmatpush3.msra.mxu1 %v559_v4  ;;  %v733_v4 = vld [vmem:[#allocation2 + $0x2f0] sm:$0xff] }
  0x42   : > { %2337 = vmatprep.subr.mxu0 %v408_v51  ;;  %2370 = vmatprep.subr.mxu1 %v558_v6 }
  0x43   : > { %2338 = vmatpush3.msra.mxu0 %v408_v51  ;;  %2371 = vmatpush3.msra.mxu1 %v558_v6  ;;  %v732_v6 = vld [vmem:[#allocation2 + $0x2e8] sm:$0xff] }
  0x44   : > { %2339 = vmatprep.subr.mxu0 %v407_v52  ;;  %2372 = vmatprep.subr.mxu1 %v557_v8 }
  0x45   : > { %2340 = vmatpush3.msra.mxu0 %v407_v52  ;;  %2373 = vmatpush3.msra.mxu1 %v557_v8  ;;  %v730_v8 = vld [vmem:[#allocation2 + $0x2d8] sm:$0xff] }
  0x46   : > { %2341 = vmatprep.subr.mxu0 %v406_v53  ;;  %2374 = vmatprep.subr.mxu1 %v556_v10 }
  0x47   : > { %2342 = vmatpush3.msra.mxu0 %v406_v53  ;;  %2375 = vmatpush3.msra.mxu1 %v556_v10  ;;  %v728_v10 = vld [vmem:[#allocation2 + $0x2c8] sm:$0xff] }
  0x48   : > { %2343 = vmatprep.subr.mxu0 %v405_v54  ;;  %2376 = vmatprep.subr.mxu1 %v555_v12 }
  0x49   : > { %2344 = vmatpush3.msra.mxu0 %v405_v54  ;;  %2377 = vmatpush3.msra.mxu1 %v555_v12  ;;  %v726_v12 = vld [vmem:[#allocation2 + $0x2b8] sm:$0xff] }
  0x4a   : > { %2345 = vmatprep.subr.mxu0 %v404_v55  ;;  %2378 = vmatprep.subr.mxu1 %v554_v14 }
  0x4b   : > { %2346 = vmatpush3.msra.mxu0 %v404_v55  ;;  %2379 = vmatpush3.msra.mxu1 %v554_v14  ;;  %v724_v14 = vld [vmem:[#allocation2 + $0x2a8] sm:$0xff] }
  0x4c   : > { %2347 = vmatprep.subr.mxu0 %v403_v56  ;;  %2380 = vmatprep.subr.mxu1 %v553_v16 }
  0x4d   : > { %2348 = vmatpush3.msra.mxu0 %v403_v56  ;;  %2381 = vmatpush3.msra.mxu1 %v553_v16  ;;  %v722_v16 = vld [vmem:[#allocation2 + $0x298] sm:$0xff] }
  0x4e   : > { %2349 = vmatprep.subr.mxu0 %v402_v57  ;;  %2382 = vmatprep.subr.mxu1 %v552_v18 }
  0x4f   : > { %2350 = vmatpush3.msra.mxu0 %v402_v57  ;;  %2383 = vmatpush3.msra.mxu1 %v552_v18  ;;  %v720_v18 = vld [vmem:[#allocation2 + $0x288] sm:$0xff] }
  0x50   : > { %2351 = vmatprep.subr.mxu0 %v401_v58  ;;  %2384 = vmatprep.subr.mxu1 %v551_v20 }
  0x51   : > { %2352 = vmatpush3.msra.mxu0 %v401_v58  ;;  %2385 = vmatpush3.msra.mxu1 %v551_v20 }
  0x52   : > { %2353 = vmatprep.subr.mxu0 %v400_v59  ;;  %2386 = vmatprep.subr.mxu1 %v550_v22 }
  0x53   : > { %2354 = vmatpush3.msra.mxu0 %v400_v59  ;;  %2387 = vmatpush3.msra.mxu1 %v550_v22 }
  0x54   : > { %2355 = vmatprep.subr.mxu0 %v399_v60  ;;  %2388 = vmatprep.subr.mxu1 %v549_v24 }
  0x55   : > { %2356 = vmatpush3.msra.mxu0 %v399_v60  ;;  %2389 = vmatpush3.msra.mxu1 %v549_v24 }
  0x56   : > { %2357 = vmatprep.subr.mxu0 %v398_v61  ;;  %2390 = vmatprep.subr.mxu1 %v548_v26 }
  0x57   : > { %2358 = vmatpush3.msra.mxu0 %v398_v61  ;;  %2391 = vmatpush3.msra.mxu1 %v548_v26 }
  0x58   : > { %2359 = vmatprep.subr.mxu0 %v397_v62  ;;  %2392 = vmatprep.subr.mxu1 %v547_v28 }
  0x59   : > { %2360 = vmatpush3.msra.mxu0 %v397_v62  ;;  %2393 = vmatpush3.msra.mxu1 %v547_v28 }
  0x5a   : > { %2361 = vmatprep.subr.mxu0 %v396_v63  ;;  %2394 = vmatprep.subr.mxu1 %v546_v30 }
  0x5b   : > { %2362 = vmatpush3.msra.mxu0 %v396_v63  ;;  %2395 = vmatpush3.msra.mxu1 %v546_v30 }
  0x5c   : > { %2363 = vmatprep.subr.mxu0 %v395_v1  ;;  %2396 = vmatprep.subr.mxu1 %v545_v32 }
  0x5d   : > { %2364 = vmatpush3.msra.mxu0 %v395_v1  ;;  %2397 = vmatpush3.msra.mxu1 %v545_v32 }
  0x5e   : > { %2366 = vmatmul.mubr.f32.vlgmr.msra.gmra.mxu0 %v416_v2  ;;  %2403 = vmatprep.subr.mxu0 %v543_v3 }
  0x5f   : > { %2404 = vmatpush3.msra.mxu0 %v543_v3  ;;  %2398 = vmatprep.subr.mxu1 %v544_v34 }
  0x60   : > { %2405 = vmatprep.subr.mxu0 %v542_v5  ;;  %2399 = vmatpush3.msra.mxu1 %v544_v34 }
  0x61   : > { %2406 = vmatpush3.msra.mxu0 %v542_v5  ;;  %2438 = vmatprep.subr.mxu1 %v734_v35 }
  0x62   : > { %2407 = vmatprep.subr.mxu0 %v541_v7 }
  0x63   : > { %2408 = vmatpush3.msra.mxu0 %v541_v7  ;;  %v731_v7 = vld [vmem:[#allocation2 + $0x2e0] sm:$0xff] }
  0x64   : > { %2409 = vmatprep.subr.mxu0 %v540_v9 }
  0x65   : > { %2410 = vmatpush3.msra.mxu0 %v540_v9  ;;  %v729_v9 = vld [vmem:[#allocation2 + $0x2d0] sm:$0xff] }
  0x66   : > { %2411 = vmatprep.subr.mxu0 %v539_v11 }
  0x67   : > { %2412 = vmatpush3.msra.mxu0 %v539_v11  ;;  %v727_v11 = vld [vmem:[#allocation2 + $0x2c0] sm:$0xff] }
  0x68   : > { %2413 = vmatprep.subr.mxu0 %v538_v13 }
  0x69   : > { %2414 = vmatpush3.msra.mxu0 %v538_v13  ;;  %v725_v13 = vld [vmem:[#allocation2 + $0x2b0] sm:$0xff] }
  0x6a   : > { %2415 = vmatprep.subr.mxu0 %v537_v15 }
  0x6b   : > { %2416 = vmatpush3.msra.mxu0 %v537_v15  ;;  %v723_v15 = vld [vmem:[#allocation2 + $0x2a0] sm:$0xff] }
  0x6c   : > { %2417 = vmatprep.subr.mxu0 %v536_v17 }
  0x6d   : > { %2418 = vmatpush3.msra.mxu0 %v536_v17  ;;  %v721_v17 = vld [vmem:[#allocation2 + $0x290] sm:$0xff] }
  0x6e   : > { %2419 = vmatprep.subr.mxu0 %v535_v19 }
  0x6f   : > { %2420 = vmatpush3.msra.mxu0 %v535_v19  ;;  %v719_v19 = vld [vmem:[#allocation2 + $0x280] sm:$0xff] }
  0x70   : > { %2421 = vmatprep.subr.mxu0 %v534_v21 }
  0x71   : > { %2422 = vmatpush3.msra.mxu0 %v534_v21 }
  0x72   : > { %2423 = vmatprep.subr.mxu0 %v533_v23 }
  0x73   : > { %2424 = vmatpush3.msra.mxu0 %v533_v23 }
  0x74   : > { %2425 = vmatprep.subr.mxu0 %v532_v25 }
  0x75   : > { %2426 = vmatpush3.msra.mxu0 %v532_v25 }
  0x76   : > { %2427 = vmatprep.subr.mxu0 %v531_v27 }
  0x77   : > { %2428 = vmatpush3.msra.mxu0 %v531_v27 }
  0x78   : > { %2429 = vmatprep.subr.mxu0 %v530_v29 }
  0x79   : > { %2430 = vmatpush3.msra.mxu0 %v530_v29 }
  0x7a   : > { %2431 = vmatprep.subr.mxu0 %v529_v31 }
  0x7b   : > { %2432 = vmatpush3.msra.mxu0 %v529_v31  ;;  %v1967_v31 = vld [vmem:[%s3193_s2 + $0x2] ss:$0 sm:$0xff] }
  0x7c   : > { %2433 = vmatprep.subr.mxu0 %v528_v33 }
  0x7d   : > { %2434 = vmatpush3.msra.mxu0 %v528_v33 }
  0xfd   : > { %v2297_v36 = vpop.f32.mrf.mxu0 }
  0xfe   : > { %v2332_v37 = vpop.f32.mrf.mxu1 }
  0xff   : > { %v311_v38 = vpop.f32.mrf.mxu0  ;;  %v392_v40 = vadd.f32 %v2332_v37, %v2297_v36 }
 0x100   : > { %v386_v39 = vpop.f32.mrf.mxu1 }
 0x101   : > { %v387_v43 = vadd.f32 %v386_v39, %v311_v38 }
 0x11e   : > { %v2367_v41 = vpop.f32.mrf.mxu0 }
 0x11f   : > { %v495_v44 = vadd.f32 %v2367_v41, %v392_v40  ;;  %v919_v40 = vld [vmem:[#allocation2 + $0x3f8] sm:$0xff]  ;;  %v918_v41 = vld [vmem:[#allocation2 + $0x3f0] sm:$0xff] }
 0x120   : > { %v485_v46 = vpop.f32.mrf.mxu0  ;;  %2473 = vmatprep.subr.mxu0 %v919_v40 }
 0x121   : > { %v502_v47 = vadd.f32 %v1965_v42, %v495_v44  ;;  %v494_v48 = vadd.f32 %v485_v46, %v387_v43  ;;  %v917_v44 = vld [vmem:[#allocation2 + $0x3e8] sm:$0xff]  ;;  %v916_v46 = vld [vmem:[#allocation2 + $0x3e0] sm:$0xff] }
 0x123   : > { %vm504_vm3 = vcmp.gt.f32.partialorder %v502_v47, 0.0  ;;  %v511_v49 = vmul.f32 %v1966_v45, %v502_v47  ;;  %v501_v50 = vadd.f32 %v1965_v42, %v494_v48  ;;  %v903_v42 = vld [vmem:[#allocation2 + $0x378] sm:$0xff]  ;;  %v901_v48 = vld [vmem:[#allocation2 + $0x368] sm:$0xff] }
 0x125   : > { %v513_v51 = vsel %vm504_vm3, %v502_v47, %v511_v49  ;;  %vm503_vm4 = vcmp.gt.f32.partialorder %v501_v50, 0.0  ;;  %v510_v52 = vmul.f32 %v1966_v45, %v501_v50  ;;  %v902_v45 = vld [vmem:[#allocation2 + $0x370] sm:$0xff]  ;;  %v915_v49 = vld [vmem:[#allocation2 + $0x3d8] sm:$0xff] }
 0x126   : > { %v524_v53 = vrot.slane %v513_v51, 5  ;;  %v519_v54 = vrot.slane %v513_v51, 7  ;;  %v914_v51 = vld [vmem:[#allocation2 + $0x3d0] sm:$0xff] }
 0x127   : > { %v512_v55 = vsel %vm503_vm4, %v501_v50, %v510_v52  ;;  %v900_v50 = vld [vmem:[#allocation2 + $0x360] sm:$0xff]  ;;  %v899_v52 = vld [vmem:[#allocation2 + $0x358] sm:$0xff] }
 0x128   : > { %v515_v56 = vrot.slane %v512_v55, 1  ;;  %v518_v57 = vrot.slane %v512_v55, 7  ;;  %v3008_v58 = vsel %vm192_vm0, %v519_v54, %v524_v53  ;;  %v913_v53 = vld [vmem:[#allocation2 + $0x3c8] sm:$0xff]  ;;  %v912_v55 = vld [vmem:[#allocation2 + $0x3c0] sm:$0xff] }
 0x129   : > { %v565_v61 = vrot.slane %v3008_v58, 1  ;;  %v738_v20 = vrot.slane %v3008_v58, 2  ;;  %v896_v58 = vld [vmem:[#allocation2 + $0x340] sm:$0xff] }
 0x12a   : > { %v526_v59 = vsel %vm192_vm0, %v515_v56, %v518_v57  ;;  %v3012_v60 = vsel %vm192_vm0, %v518_v57, %v519_v54  ;;  %v898_v54 = vld [vmem:[#allocation2 + $0x350] sm:$0xff]  ;;  %v897_v56 = vld [vmem:[#allocation2 + $0x348] sm:$0xff]  ;;  %v911_v57 = vld [vmem:[#allocation2 + $0x3b8] sm:$0xff] }
 0x12b   : > { %v562_v62 = vrot.slane %v526_v59, 1  ;;  %2435 = vmatprep.mubr.f32.mxu0 %v526_v59  ;;  %v735_v63 = vrot.slane %v526_v59, 2  ;;  %v563_v0 = vrot.slane %v3012_v60, 1  ;;  %v736_v1 = vrot.slane %v3012_v60, 2  ;;  %v910_v59 = vld [vmem:[#allocation2 + $0x3b0] sm:$0xff] }
 0x12c   : > { %2436 = vmatmul.mubr.f32.vlgmr.msra.gmra.mxu0 %v3012_v60  ;;  %v895_v60 = vld [vmem:[#allocation2 + $0x338] sm:$0xff] }
 0x12d   : > { %v564_v2 = vsel %vm237_vm1, %v562_v62, %v563_v0  ;;  %v566_v3 = vsel %vm237_vm1, %v563_v0, %v565_v61  ;;  %v737_v5 = vsel %vm411_vm2, %v735_v63, %v736_v1  ;;  %v739_v21 = vsel %vm411_vm2, %v736_v1, %v738_v20  ;;  %2474 = vmatpush3.msra.mxu0 %v919_v40  ;;  %v909_v61 = vld [vmem:[#allocation2 + $0x3a8] sm:$0xff]  ;;  %v894_v62 = vld [vmem:[#allocation2 + $0x330] sm:$0xff]  ;;  %v908_v63 = vld [vmem:[#allocation2 + $0x3a0] sm:$0xff] }
 0x12e   : > { %2400 = vmatprep.mubr.f32.mxu1 %v564_v2  ;;  %2475 = vmatprep.subr.mxu0 %v918_v41  ;;  %v893_v0 = vld [vmem:[#allocation2 + $0x328] sm:$0xff]  ;;  %v907_v1 = vld [vmem:[#allocation2 + $0x398] sm:$0xff]  ;;  %v892_v2 = vld [vmem:[#allocation2 + $0x320] sm:$0xff] }
 0x12f   : > { %2401 = vmatmul.mubr.f32.vlgmr.msra.gmra.mxu1 %v566_v3  ;;  %2476 = vmatpush3.msra.mxu0 %v918_v41  ;;  %v906_v3 = vld [vmem:[#allocation2 + $0x390] sm:$0xff] }
 0x130   : > { %2439 = vmatpush3.msra.mxu1 %v734_v35  ;;  %2470 = vmatprep.mubr.f32.mxu1 %v737_v5  ;;  %v905_v5 = vld [vmem:[#allocation2 + $0x388] sm:$0xff] }
 0x131   : > { %2440 = vmatprep.subr.mxu1 %v733_v4  ;;  %2477 = vmatprep.subr.mxu0 %v917_v44 }
 0x132   : > { %2441 = vmatpush3.msra.mxu1 %v733_v4  ;;  %2478 = vmatpush3.msra.mxu0 %v917_v44  ;;  %v891_v4 = vld [vmem:[#allocation2 + $0x318] sm:$0xff] }
 0x133   : > { %2442 = vmatprep.subr.mxu1 %v732_v6  ;;  %2479 = vmatprep.subr.mxu0 %v916_v46 }
 0x134   : > { %2443 = vmatpush3.msra.mxu1 %v732_v6  ;;  %2480 = vmatpush3.msra.mxu0 %v916_v46  ;;  %v890_v6 = vld [vmem:[#allocation2 + $0x310] sm:$0xff] }
 0x135   : > { %2444 = vmatprep.subr.mxu1 %v731_v7  ;;  %2481 = vmatprep.subr.mxu0 %v915_v49 }
 0x136   : > { %2445 = vmatpush3.msra.mxu1 %v731_v7  ;;  %2482 = vmatpush3.msra.mxu0 %v915_v49  ;;  %v904_v7 = vld [vmem:[#allocation2 + $0x380] sm:$0xff]  ;;  %v1186_v49 = vld [vmem:[#allocation2 + $0x4f0] sm:$0xff] }
 0x137   : > { %2446 = vmatprep.subr.mxu1 %v730_v8  ;;  %2483 = vmatprep.subr.mxu0 %v914_v51 }
 0x138   : > { %2447 = vmatpush3.msra.mxu1 %v730_v8  ;;  %2484 = vmatpush3.msra.mxu0 %v914_v51 }
 0x139   : > { %2448 = vmatprep.subr.mxu1 %v729_v9  ;;  %2485 = vmatprep.subr.mxu0 %v913_v53 }
 0x13a   : > { %2449 = vmatpush3.msra.mxu1 %v729_v9  ;;  %2486 = vmatpush3.msra.mxu0 %v913_v53  ;;  %v889_v9 = vld [vmem:[#allocation2 + $0x308] sm:$0xff] }
 0x13b   : > { %2450 = vmatprep.subr.mxu1 %v728_v10  ;;  %2487 = vmatprep.subr.mxu0 %v912_v55 }
 0x13c   : > { %2451 = vmatpush3.msra.mxu1 %v728_v10  ;;  %2488 = vmatpush3.msra.mxu0 %v912_v55  ;;  %v1185_v55 = vld [vmem:[#allocation2 + $0x4e8] sm:$0xff] }
 0x13d   : > { %2452 = vmatprep.subr.mxu1 %v727_v11  ;;  %2489 = vmatprep.subr.mxu0 %v911_v57 }
 0x13e   : > { %2453 = vmatpush3.msra.mxu1 %v727_v11  ;;  %2490 = vmatpush3.msra.mxu0 %v911_v57  ;;  %v1184_v57 = vld [vmem:[#allocation2 + $0x4e0] sm:$0xff] }
 0x13f   : > { %2454 = vmatprep.subr.mxu1 %v726_v12  ;;  %2491 = vmatprep.subr.mxu0 %v910_v59 }
 0x140   : > { %2455 = vmatpush3.msra.mxu1 %v726_v12  ;;  %2492 = vmatpush3.msra.mxu0 %v910_v59  ;;  %v1085_v12 = vld [vmem:[#allocation2 + $0x478] sm:$0xff] }
 0x141   : > { %2456 = vmatprep.subr.mxu1 %v725_v13  ;;  %2493 = vmatprep.subr.mxu0 %v909_v61  ;;  %v1183_v59 = vld [vmem:[#allocation2 + $0x4d8] sm:$0xff] }
 0x142   : > { %2457 = vmatpush3.msra.mxu1 %v725_v13  ;;  %2494 = vmatpush3.msra.mxu0 %v909_v61  ;;  %v1182_v61 = vld [vmem:[#allocation2 + $0x4d0] sm:$0xff] }
 0x143   : > { %2458 = vmatprep.subr.mxu1 %v724_v14  ;;  %2495 = vmatprep.subr.mxu0 %v908_v63 }
 0x144   : > { %2459 = vmatpush3.msra.mxu1 %v724_v14  ;;  %2496 = vmatpush3.msra.mxu0 %v908_v63  ;;  %v1181_v63 = vld [vmem:[#allocation2 + $0x4c8] sm:$0xff] }
 0x145   : > { %2460 = vmatprep.subr.mxu1 %v723_v15  ;;  %2497 = vmatprep.subr.mxu0 %v907_v1 }
 0x146   : > { %2461 = vmatpush3.msra.mxu1 %v723_v15  ;;  %2498 = vmatpush3.msra.mxu0 %v907_v1  ;;  %v888_v15 = vld [vmem:[#allocation2 + $0x300] sm:$0xff] }
 0x147   : > { %2462 = vmatprep.subr.mxu1 %v722_v16  ;;  %2499 = vmatprep.subr.mxu0 %v906_v3  ;;  %v1180_v1 = vld [vmem:[#allocation2 + $0x4c0] sm:$0xff] }
 0x148   : > { %2463 = vmatpush3.msra.mxu1 %v722_v16  ;;  %2500 = vmatpush3.msra.mxu0 %v906_v3  ;;  %v1179_v3 = vld [vmem:[#allocation2 + $0x4b8] sm:$0xff] }
 0x149   : > { %2464 = vmatprep.subr.mxu1 %v721_v17  ;;  %2501 = vmatprep.subr.mxu0 %v905_v5 }
 0x14a   : > { %2465 = vmatpush3.msra.mxu1 %v721_v17  ;;  %2502 = vmatpush3.msra.mxu0 %v905_v5  ;;  %v1178_v5 = vld [vmem:[#allocation2 + $0x4b0] sm:$0xff] }
 0x14b   : > { %2466 = vmatprep.subr.mxu1 %v720_v18  ;;  %2503 = vmatprep.subr.mxu0 %v904_v7 }
 0x14c   : > { %2467 = vmatpush3.msra.mxu1 %v720_v18  ;;  %2504 = vmatpush3.msra.mxu0 %v904_v7 }
 0x14d   : > { %2468 = vmatprep.subr.mxu1 %v719_v19  ;;  %2543 = vmatprep.subr.mxu0 %v1085_v12 }
 0x14e   : > { %2469 = vmatpush3.msra.mxu1 %v719_v19  ;;  %v1187_v19 = vld [vmem:[#allocation2 + $0x4f8] sm:$0xff] }
 0x14f   : > { %2471 = vmatmul.mubr.f32.vlgmr.msra.gmra.mxu1 %v739_v21  ;;  %2508 = vmatprep.subr.mxu1 %v903_v42 }
 0x150   : > { %2509 = vmatpush3.msra.mxu1 %v903_v42 }
 0x151   : > { %2510 = vmatprep.subr.mxu1 %v902_v45 }
 0x152   : > { %2511 = vmatpush3.msra.mxu1 %v902_v45 }
 0x153   : > { %2512 = vmatprep.subr.mxu1 %v901_v48 }
 0x154   : > { %2513 = vmatpush3.msra.mxu1 %v901_v48 }
 0x155   : > { %2514 = vmatprep.subr.mxu1 %v900_v50 }
 0x156   : > { %2515 = vmatpush3.msra.mxu1 %v900_v50 }
 0x157   : > { %2516 = vmatprep.subr.mxu1 %v899_v52 }
 0x158   : > { %2517 = vmatpush3.msra.mxu1 %v899_v52  ;;  %v1082_v52 = vld [vmem:[#allocation2 + $0x460] sm:$0xff] }
 0x159   : > { %2518 = vmatprep.subr.mxu1 %v898_v54 }
 0x15a   : > { %2519 = vmatpush3.msra.mxu1 %v898_v54 }
 0x15b   : > { %2520 = vmatprep.subr.mxu1 %v897_v56 }
 0x15c   : > { %2521 = vmatpush3.msra.mxu1 %v897_v56  ;;  %v1081_v56 = vld [vmem:[#allocation2 + $0x458] sm:$0xff] }
 0x15d   : > { %2522 = vmatprep.subr.mxu1 %v896_v58 }
 0x15e   : > { %2523 = vmatpush3.msra.mxu1 %v896_v58  ;;  %v1080_v58 = vld [vmem:[#allocation2 + $0x450] sm:$0xff] }
 0x15f   : > { %2524 = vmatprep.subr.mxu1 %v895_v60 }
 0x160   : > { %2525 = vmatpush3.msra.mxu1 %v895_v60  ;;  %v1079_v60 = vld [vmem:[#allocation2 + $0x448] sm:$0xff] }
 0x161   : > { %2526 = vmatprep.subr.mxu1 %v894_v62 }
 0x162   : > { %2527 = vmatpush3.msra.mxu1 %v894_v62  ;;  %v1078_v62 = vld [vmem:[#allocation2 + $0x440] sm:$0xff] }
 0x163   : > { %2528 = vmatprep.subr.mxu1 %v893_v0 }
 0x164   : > { %2529 = vmatpush3.msra.mxu1 %v893_v0  ;;  %v1077_v0 = vld [vmem:[#allocation2 + $0x438] sm:$0xff] }
 0x165   : > { %2530 = vmatprep.subr.mxu1 %v892_v2 }
 0x166   : > { %2531 = vmatpush3.msra.mxu1 %v892_v2  ;;  %v1076_v2 = vld [vmem:[#allocation2 + $0x430] sm:$0xff] }
 0x167   : > { %2532 = vmatprep.subr.mxu1 %v891_v4 }
 0x168   : > { %2533 = vmatpush3.msra.mxu1 %v891_v4  ;;  %v1075_v4 = vld [vmem:[#allocation2 + $0x428] sm:$0xff] }
 0x169   : > { %2534 = vmatprep.subr.mxu1 %v890_v6 }
 0x16a   : > { %2535 = vmatpush3.msra.mxu1 %v890_v6  ;;  %v1074_v6 = vld [vmem:[#allocation2 + $0x420] sm:$0xff] }
 0x16b   : > { %2536 = vmatprep.subr.mxu1 %v889_v9 }
 0x16c   : > { %2537 = vmatpush3.msra.mxu1 %v889_v9  ;;  %v1073_v9 = vld [vmem:[#allocation2 + $0x418] sm:$0xff] }
 0x16d   : > { %2538 = vmatprep.subr.mxu1 %v888_v15 }
 0x16e   : > { %2539 = vmatpush3.msra.mxu1 %v888_v15  ;;  %v1071_v15 = vld [vmem:[#allocation2 + $0x408] sm:$0xff] }
 0x16f   : > { %2578 = vmatprep.subr.mxu1 %v1187_v19 }
 0x1ec   : > { %v2437_v23 = vpop.f32.mrf.mxu0 }
 0x1ee   : > { %v710_v25 = vpop.f32.mrf.mxu0 }
 0x1ef   : > { %v2402_v22 = vpop.f32.mrf.mxu1 }
 0x1f0   : > { %v716_v29 = vadd.f32 %v2437_v23, %v2402_v22 }
 0x1f1   : > { %v635_v24 = vpop.f32.mrf.mxu1 }
 0x1f2   : > { %v711_v27 = vadd.f32 %v710_v25, %v635_v24 }
 0x20f   : > { %v2472_v26 = vpop.f32.mrf.mxu1 }
 0x210   : > { %v818_v32 = vadd.f32 %v2472_v26, %v716_v29 }
 0x211   : > { %v808_v28 = vpop.f32.mrf.mxu1 }
 0x212   : > { %v817_v30 = vadd.f32 %v808_v28, %v711_v27  ;;  %v3029_v34 = vadd.f32 %v1967_v31, %v818_v32 }
 0x214   : > { %v3026_v33 = vadd.f32 %v1967_v31, %v817_v30 }
 0x216   : > { %826 = vrot.lane.b32.xlu0 %v3026_v33, %s2914_s5 }
 0x21a   : > { %828 = vrot.lane.b32.xlu0 %v3029_v34, %s2914_s5 }
 0x288   : > { %v827_v35 = vpop.permute.xlu0 %826 }
 0x289   : > { %v3033_v37 = vmax.f32 %v3026_v33, %v827_v35  ;;  %v3045_v47 = vadd.f32 %v827_v35, %v3026_v33 }
 0x28c   : > { %v829_v36 = vpop.permute.xlu0 %828 }
 0x28d   : > { %v3036_v38 = vmax.f32 %v3029_v34, %v829_v36  ;;  %v3039_v39 = vadd.f32 %v829_v36, %v3029_v34 }
 0x28f   : > { %848 = vrot.lane.b32.xlu0 %v3039_v39, %s2915_s6  ;;  %v2849_v43 = vpack.i.bf16 %v3036_v38, %v3033_v37 }
 0x291   : > { %2850 = vrot.lane.b32.xlu1 %v2849_v43, %s2915_s6  ;;  %v1084_v43 = vld [vmem:[#allocation2 + $0x470] sm:$0xff] }
 0x295   : > { %846 = vrot.lane.b32.xlu1 %v3045_v47, %s2915_s6 }
 0x301   : > { %v849_v20 = vpop.permute.xlu0 %848 }
 0x302   : > { %v851_v21 = vadd.f32 %v849_v20, %v3039_v39 }
 0x303   : > { %v2851_v8 = vpop.permute.xlu1 %2850 }
 0x304   : > { %v2853_v10 = vunpack.i.h.bf16 %v2851_v8  ;;  %v2852_v11 = vunpack.i.l.bf16 %v2851_v8  ;;  %v1177_v8 = vld [vmem:[#allocation2 + $0x4a8] sm:$0xff] }
 0x306   : > { %v837_v13 = vmax.f32 %v3036_v38, %v2853_v10  ;;  %v836_v14 = vmax.f32 %v3033_v37, %v2852_v11  ;;  %v1176_v10 = vld [vmem:[#allocation2 + $0x4a0] sm:$0xff]  ;;  %v1072_v11 = vld [vmem:[#allocation2 + $0x410] sm:$0xff] }
 0x307   : > { %v847_v16 = vpop.permute.xlu1 %846 }
 0x308   : > { %v850_v17 = vadd.f32 %v847_v16, %v3045_v47  ;;  %v2854_v18 = vpack.i.bf16 %v837_v13, %v836_v14  ;;  %v1083_v47 = vld [vmem:[#allocation2 + $0x468] sm:$0xff]  ;;  %v1174_v16 = vld [vmem:[#allocation2 + $0x490] sm:$0xff] }
 0x30a   : > { %852 = vrot.lane.b32.xlu0 %v850_v17, %s2916_s7  ;;  %2855 = vrot.lane.b32.xlu1 %v2854_v18, %s2916_s7 }
 0x30e   : > { %854 = vrot.lane.b32.xlu1 %v851_v21, %s2916_s7 }
 0x37c   : > { %v853_v22 = vpop.permute.xlu0 %852  ;;  %v2856_v23 = vpop.permute.xlu1 %2855 }
 0x37d   : > { %v856_v24 = vadd.f32 %v853_v22, %v850_v17  ;;  %v2858_v25 = vunpack.i.h.bf16 %v2856_v23  ;;  %v2857_v26 = vunpack.i.l.bf16 %v2856_v23  ;;  %v1070_v17 = vld [vmem:[#allocation2 + $0x400] sm:$0xff]  ;;  %v1289_v22 = vld [vmem:[#allocation2 + $0x578] sm:$0xff] }
 0x37e   : > { %v1172_v23 = vld [vmem:[#allocation2 + $0x480] sm:$0xff] }
 0x37f   : > { %v858_v27 = vmul.f32 0.125, %v856_v24  ;;  %v3052_v28 = vmax.f32 %v837_v13, %v2858_v25  ;;  %v842_v29 = vmax.f32 %v836_v14, %v2857_v26  ;;  %v1175_v14 = vld [vmem:[#allocation2 + $0x498] sm:$0xff] }
 0x380   : > { %v855_v30 = vpop.permute.xlu1 %854 }
 0x381   : > { %v861_v31 = vrot.slane %v858_v27, 1  ;;  %v864_v32 = vrot.slane %v858_v27, 7  ;;  %v879_v35 = vrot.slane %v3052_v28, 7  ;;  %v875_v36 = vrot.slane %v842_v29, 1  ;;  %v1288_v27 = vld [vmem:[#allocation2 + $0x570] sm:$0xff] }
 0x382   : > { %v878_v37 = vrot.slane %v842_v29, 7  ;;  %v857_v38 = vadd.f32 %v855_v30, %v851_v21 }
 0x383   : > { %v3056_v39 = vsel %vm192_vm0, %v861_v31, %v864_v32  ;;  %v1389_v31 = vld [vmem:[#allocation2 + $0x5f8] sm:$0xff] }
 0x384   : > { %v3058_v40 = vmul.f32 0.125, %v857_v38  ;;  %v3061_v41 = vsel %vm192_vm0, %v875_v36, %v878_v37  ;;  %2540 = vmatprep.mubr.f32.mxu1 %v3056_v39  ;;  %v3068_v42 = vsel %vm192_vm0, %v878_v37, %v879_v35  ;;  %v1088_v50 = vrot.slane %v3056_v39, 1  ;;  %v1388_v36 = vld [vmem:[#allocation2 + $0x5f0] sm:$0xff]  ;;  %v1286_v38 = vld [vmem:[#allocation2 + $0x560] sm:$0xff] }
 0x385   : > { %2505 = vmatprep.mubr.f32.mxu0 %v3061_v41  ;;  %v1190_v45 = vrot.slane %v3061_v41, 1  ;;  %v1191_v46 = vrot.slane %v3068_v42, 1  ;;  %v1290_v24 = vrot.slane %v3056_v39, 2  ;;  %v1391_v29 = vrot.slane %v3068_v42, 2  ;;  %v1387_v39 = vld [vmem:[#allocation2 + $0x5e8] sm:$0xff] }
 0x386   : > { %v865_v44 = vrot.slane %v3058_v40, 7  ;;  %2506 = vmatmul.mubr.f32.vlgmr.msra.gmra.mxu0 %v3068_v42  ;;  %v870_v7 = vrot.slane %v3058_v40, 5  ;;  %v1285_v40 = vld [vmem:[#allocation2 + $0x558] sm:$0xff] }
 0x387   : > { %2544 = vmatpush3.msra.mxu0 %v1085_v12  ;;  %v1192_v53 = vsel %vm237_vm1, %v1190_v45, %v1191_v46  ;;  %v884_v12 = vrot.slane %v3052_v28, 5  ;;  %v1390_v28 = vrot.slane %v3061_v41, 2  ;;  %v1386_v41 = vld [vmem:[#allocation2 + $0x5e0] sm:$0xff]  ;;  %v1283_v45 = vld [vmem:[#allocation2 + $0x548] sm:$0xff]  ;;  %v1515_v42 = vld [vmem:[#allocation2 + $0x758] sm:$0xff] }
 0x388   : > { %2545 = vmatprep.subr.mxu0 %v1084_v43  ;;  %v3077_v48 = vsel %vm192_vm0, %v864_v32, %v865_v44  ;;  %v3093_v13 = vsel %vm192_vm0, %v865_v44, %v870_v7  ;;  %v1287_v32 = vld [vmem:[#allocation2 + $0x568] sm:$0xff]  ;;  %v1385_v44 = vld [vmem:[#allocation2 + $0x5d8] sm:$0xff]  ;;  %v2917_v7 = vmov 0.0  }
 0x389   : > { %2546 = vmatpush3.msra.mxu0 %v1084_v43  ;;  %2541 = vmatmul.mubr.f32.vlgmr.msra.gmra.mxu1 %v3077_v48  ;;  %v1089_v51 = vrot.slane %v3077_v48, 1  ;;  %v1091_v18 = vrot.slane %v3093_v13, 1  ;;  %v3099_v20 = vsel %vm192_vm0, %v879_v35, %v884_v12  ;;  %v1291_v21 = vrot.slane %v3077_v48, 2  ;;  %v1284_v43 = vld [vmem:[#allocation2 + $0x550] sm:$0xff]  ;;  %v1517_v48 = vld [vmem:[#allocation2 + $0x768] sm:$0xff] }
 0x38a   : > { %2547 = vmatprep.subr.mxu0 %v1083_v47  ;;  %2579 = vmatpush3.msra.mxu1 %v1187_v19  ;;  %v1173_v19 = vld [vmem:[#allocation2 + $0x488] sm:$0xff]  ;;  %v1193_v26 = vrot.slane %v3099_v20, 1  ;;  %v1392_v37 = vsel %vm411_vm2, %v1390_v28, %v1391_v29  ;;  %v1504_v28 = vld [vmem:[#allocation2 + $0x700] sm:$0xff] }
 0x38b   : > { %2548 = vmatpush3.msra.mxu0 %v1083_v47  ;;  %2580 = vmatprep.subr.mxu1 %v1186_v49  ;;  %v1090_v54 = vsel %vm237_vm1, %v1088_v50, %v1089_v51  ;;  %v1092_v25 = vsel %vm237_vm1, %v1089_v51, %v1091_v18  ;;  %v1292_v30 = vsel %vm411_vm2, %v1290_v24, %v1291_v21  ;;  %v1282_v47 = vld [vmem:[#allocation2 + $0x540] sm:$0xff]  ;;  %v1281_v50 = vld [vmem:[#allocation2 + $0x538] sm:$0xff] }
 0x38c   : > { %2610 = vmatprep.mubr.f32.mxu1 %v1192_v53  ;;  %2549 = vmatprep.subr.mxu0 %v1082_v52  ;;  %v1194_v35 = vsel %vm237_vm1, %v1191_v46, %v1193_v26  ;;  %v1384_v46 = vld [vmem:[#allocation2 + $0x5d0] sm:$0xff]  ;;  %v1382_v51 = vld [vmem:[#allocation2 + $0x5c0] sm:$0xff]  ;;  %v1381_v53 = vld [vmem:[#allocation2 + $0x5b8] sm:$0xff] }
 0x38d   : > { %2581 = vmatpush3.msra.mxu1 %v1186_v49  ;;  %2550 = vmatpush3.msra.mxu0 %v1082_v52  ;;  %v1383_v49 = vld [vmem:[#allocation2 + $0x5c8] sm:$0xff]  ;;  %v1280_v52 = vld [vmem:[#allocation2 + $0x530] sm:$0xff] }
 0x38e   : > { %2575 = vmatprep.mubr.f32.mxu0 %v1090_v54  ;;  %2582 = vmatprep.subr.mxu1 %v1185_v55  ;;  %v1279_v54 = vld [vmem:[#allocation2 + $0x528] sm:$0xff] }
 0x38f   : > { %2551 = vmatprep.subr.mxu0 %v1081_v56  ;;  %2583 = vmatpush3.msra.mxu1 %v1185_v55  ;;  %v1380_v55 = vld [vmem:[#allocation2 + $0x5b0] sm:$0xff]  ;;  %v1505_v26 = vld [vmem:[#allocation2 + $0x708] sm:$0xff] }
 0x390   : > { %2552 = vmatpush3.msra.mxu0 %v1081_v56  ;;  %2584 = vmatprep.subr.mxu1 %v1184_v57  ;;  %v1278_v56 = vld [vmem:[#allocation2 + $0x520] sm:$0xff] }
 0x391   : > { %2553 = vmatprep.subr.mxu0 %v1080_v58  ;;  %2585 = vmatpush3.msra.mxu1 %v1184_v57  ;;  %v1379_v57 = vld [vmem:[#allocation2 + $0x5a8] sm:$0xff] }
 0x392   : > { %2554 = vmatpush3.msra.mxu0 %v1080_v58  ;;  %2586 = vmatprep.subr.mxu1 %v1183_v59  ;;  %v1277_v58 = vld [vmem:[#allocation2 + $0x518] sm:$0xff] }
 0x393   : > { %2555 = vmatprep.subr.mxu0 %v1079_v60  ;;  %2587 = vmatpush3.msra.mxu1 %v1183_v59  ;;  %v1378_v59 = vld [vmem:[#allocation2 + $0x5a0] sm:$0xff] }
 0x394   : > { %2556 = vmatpush3.msra.mxu0 %v1079_v60  ;;  %2588 = vmatprep.subr.mxu1 %v1182_v61  ;;  %v1276_v60 = vld [vmem:[#allocation2 + $0x510] sm:$0xff] }
 0x395   : > { %2557 = vmatprep.subr.mxu0 %v1078_v62  ;;  %2589 = vmatpush3.msra.mxu1 %v1182_v61  ;;  %v1377_v61 = vld [vmem:[#allocation2 + $0x598] sm:$0xff] }
 0x396   : > { %2558 = vmatpush3.msra.mxu0 %v1078_v62  ;;  %2590 = vmatprep.subr.mxu1 %v1181_v63  ;;  %v1275_v62 = vld [vmem:[#allocation2 + $0x508] sm:$0xff] }
 0x397   : > { %2559 = vmatprep.subr.mxu0 %v1077_v0  ;;  %2591 = vmatpush3.msra.mxu1 %v1181_v63  ;;  %v1376_v63 = vld [vmem:[#allocation2 + $0x590] sm:$0xff] }
 0x398   : > { %2560 = vmatpush3.msra.mxu0 %v1077_v0  ;;  %2592 = vmatprep.subr.mxu1 %v1180_v1  ;;  %v1274_v0 = vld [vmem:[#allocation2 + $0x500] sm:$0xff] }
 0x399   : > { %2561 = vmatprep.subr.mxu0 %v1076_v2  ;;  %2593 = vmatpush3.msra.mxu1 %v1180_v1  ;;  %v1293_v1 = vrot.slane %v3093_v13, 2  ;;  %v1514_v13 = vld [vmem:[#allocation2 + $0x750] sm:$0xff] }
 0x39a   : > { %2562 = vmatpush3.msra.mxu0 %v1076_v2  ;;  %2594 = vmatprep.subr.mxu1 %v1179_v3  ;;  %v1375_v2 = vld [vmem:[#allocation2 + $0x588] sm:$0xff] }
 0x39b   : > { %2563 = vmatprep.subr.mxu0 %v1075_v4  ;;  %2595 = vmatpush3.msra.mxu1 %v1179_v3  ;;  %v1374_v3 = vld [vmem:[#allocation2 + $0x580] sm:$0xff] }
 0x39c   : > { %2564 = vmatpush3.msra.mxu0 %v1075_v4  ;;  %2596 = vmatprep.subr.mxu1 %v1178_v5  ;;  %v1393_v4 = vrot.slane %v3099_v20, 2  ;;  %v1509_v20 = vld [vmem:[#allocation2 + $0x728] sm:$0xff] }
 0x39d   : > { %2565 = vmatprep.subr.mxu0 %v1074_v6  ;;  %2597 = vmatpush3.msra.mxu1 %v1178_v5  ;;  %v1294_v5 = vsel %vm411_vm2, %v1291_v21, %v1293_v1 }
 0x39e   : > { %2566 = vmatpush3.msra.mxu0 %v1074_v6  ;;  %2598 = vmatprep.subr.mxu1 %v1177_v8  ;;  %v1519_v6 = vld [vmem:[#allocation2 + $0x778] sm:$0xff] }
 0x39f   : > { %2567 = vmatprep.subr.mxu0 %v1073_v9  ;;  %2599 = vmatpush3.msra.mxu1 %v1177_v8  ;;  %v1518_v8 = vld [vmem:[#allocation2 + $0x770] sm:$0xff] }
 0x3a0   : > { %2568 = vmatpush3.msra.mxu0 %v1073_v9  ;;  %2600 = vmatprep.subr.mxu1 %v1176_v10  ;;  %v1394_v9 = vsel %vm411_vm2, %v1391_v29, %v1393_v4  ;;  %v1968_v4 = vld [vmem:[%s3193_s2 + $0x4] ss:$0 sm:$0xff] }
 0x3a1   : > { %2569 = vmatprep.subr.mxu0 %v1072_v11  ;;  %2601 = vmatpush3.msra.mxu1 %v1176_v10  ;;  %v1495_v10 = vadd.f32 %v3029_v34, %v3026_v33 }
 0x3a2   : > { %2570 = vmatpush3.msra.mxu0 %v1072_v11  ;;  %2602 = vmatprep.subr.mxu1 %v1175_v14  ;;  %v1516_v11 = vld [vmem:[#allocation2 + $0x760] sm:$0xff] }
 0x3a3   : > { %2571 = vmatprep.subr.mxu0 %v1071_v15  ;;  %2603 = vmatpush3.msra.mxu1 %v1175_v14  ;;  %v1496_v12 = vrot.slane %v1495_v10, 4  ;;  %v1513_v14 = vld [vmem:[#allocation2 + $0x748] sm:$0xff] }
 0x3a4   : > { %2572 = vmatpush3.msra.mxu0 %v1071_v15  ;;  %2604 = vmatprep.subr.mxu1 %v1174_v16 }
 0x3a5   : > { %2573 = vmatprep.subr.mxu0 %v1070_v17  ;;  %2605 = vmatpush3.msra.mxu1 %v1174_v16  ;;  %v1497_v15 = vadd.f32 %v1496_v12, %v1495_v10  ;;  %v1512_v16 = vld [vmem:[#allocation2 + $0x740] sm:$0xff] }
 0x3a6   : > { %2574 = vmatpush3.msra.mxu0 %v1070_v17  ;;  %2606 = vmatprep.subr.mxu1 %v1173_v19  ;;  %v1511_v17 = vld [vmem:[#allocation2 + $0x738] sm:$0xff] }
 0x3a7   : > { %2576 = vmatmul.mubr.f32.vlgmr.msra.gmra.mxu0 %v1092_v25  ;;  %2607 = vmatpush3.msra.mxu1 %v1173_v19  ;;  %v1498_v18 = vrot.slane %v1497_v15, 2  ;;  %v1510_v19 = vld [vmem:[#allocation2 + $0x730] sm:$0xff] }
 0x3a8   : > { %2613 = vmatprep.subr.mxu0 %v1289_v22  ;;  %2608 = vmatprep.subr.mxu1 %v1172_v23  ;;  %v1506_v25 = vld [vmem:[#allocation2 + $0x710] sm:$0xff] }
 0x3a9   : > { %2614 = vmatpush3.msra.mxu0 %v1289_v22  ;;  %2645 = vmatprep.mubr.f32.mxu0 %v1292_v30  ;;  %v1499_v21 = vadd.f32 %v1498_v18, %v1497_v15  ;;  %v1508_v22 = vld [vmem:[#allocation2 + $0x720] sm:$0xff]  ;;  %v1610_v30 = vld [vmem:[#allocation2 + $0x7f8] sm:$0xff] }
 0x3aa   : > { %2609 = vmatpush3.msra.mxu1 %v1172_v23  ;;  %2615 = vmatprep.subr.mxu0 %v1288_v27  ;;  %v1507_v23 = vld [vmem:[#allocation2 + $0x718] sm:$0xff] }
 0x3ab   : > { %2611 = vmatmul.mubr.f32.vlgmr.msra.gmra.mxu1 %v1194_v35  ;;  %2616 = vmatpush3.msra.mxu0 %v1288_v27  ;;  %v1500_v24 = vrot.slane %v1499_v21, 1  ;;  %v1607_v35 = vld [vmem:[#allocation2 + $0x7e0] sm:$0xff] }
 0x3ac   : > { %2648 = vmatprep.subr.mxu1 %v1389_v31  ;;  %2617 = vmatprep.subr.mxu0 %v1287_v32 }
 0x3ad   : > { %2649 = vmatpush3.msra.mxu1 %v1389_v31  ;;  %2680 = vmatprep.mubr.f32.mxu1 %v1392_v37  ;;  %v1501_v27 = vadd.f32 %v1500_v24, %v1499_v21  ;;  %v1609_v31 = vld [vmem:[#allocation2 + $0x7f0] sm:$0xff]  ;;  %v1706_v24 = vld [vmem:[#allocation2 + $0x660] sm:$0xff] }
 0x3ae   : > { %2618 = vmatpush3.msra.mxu0 %v1287_v32  ;;  %2650 = vmatprep.subr.mxu1 %v1388_v36  ;;  %v1608_v32 = vld [vmem:[#allocation2 + $0x7e8] sm:$0xff]  ;;  %v1605_v37 = vld [vmem:[#allocation2 + $0x7d0] sm:$0xff] }
 0x3af   : > { %2619 = vmatprep.subr.mxu0 %v1286_v38  ;;  %2651 = vmatpush3.msra.mxu1 %v1388_v36  ;;  %v1503_v29 = vmul.f32 0.0625, %v1501_v27  ;;  %v1606_v36 = vld [vmem:[#allocation2 + $0x7d8] sm:$0xff]  ;;  %v1708_v21 = vld [vmem:[#allocation2 + $0x670] sm:$0xff] }
 0x3b0   : > { %2620 = vmatpush3.msra.mxu0 %v1286_v38  ;;  %2652 = vmatprep.subr.mxu1 %v1387_v39  ;;  %v1604_v38 = vld [vmem:[#allocation2 + $0x7c8] sm:$0xff] }
 0x3b1   : > { %2621 = vmatprep.subr.mxu0 %v1285_v40  ;;  %2653 = vmatpush3.msra.mxu1 %v1387_v39  ;;  %v1603_v39 = vld [vmem:[#allocation2 + $0x7c0] sm:$0xff] }
 0x3b2   : > { %2622 = vmatpush3.msra.mxu0 %v1285_v40  ;;  %2654 = vmatprep.subr.mxu1 %v1386_v41  ;;  %v1602_v40 = vld [vmem:[#allocation2 + $0x7b8] sm:$0xff] }
 0x3b3   : > { %2623 = vmatprep.subr.mxu0 %v1284_v43  ;;  %2655 = vmatpush3.msra.mxu1 %v1386_v41  ;;  %v1601_v41 = vld [vmem:[#allocation2 + $0x7b0] sm:$0xff] }
 0x3b4   : > { %2624 = vmatpush3.msra.mxu0 %v1284_v43  ;;  %2656 = vmatprep.subr.mxu1 %v1385_v44  ;;  %v1600_v43 = vld [vmem:[#allocation2 + $0x7a8] sm:$0xff] }
 0x3b5   : > { %2625 = vmatprep.subr.mxu0 %v1283_v45  ;;  %2657 = vmatpush3.msra.mxu1 %v1385_v44  ;;  %v1599_v44 = vld [vmem:[#allocation2 + $0x7a0] sm:$0xff] }
 0x3b6   : > { %2626 = vmatpush3.msra.mxu0 %v1283_v45  ;;  %2658 = vmatprep.subr.mxu1 %v1384_v46  ;;  %v1598_v45 = vld [vmem:[#allocation2 + $0x798] sm:$0xff] }
 0x3b7   : > { %2627 = vmatprep.subr.mxu0 %v1282_v47  ;;  %2659 = vmatpush3.msra.mxu1 %v1384_v46  ;;  %v1597_v46 = vld [vmem:[#allocation2 + $0x790] sm:$0xff] }
 0x3b8   : > { %2628 = vmatpush3.msra.mxu0 %v1282_v47  ;;  %2660 = vmatprep.subr.mxu1 %v1383_v49  ;;  %v1596_v47 = vld [vmem:[#allocation2 + $0x788] sm:$0xff] }
 0x3b9   : > { %2629 = vmatprep.subr.mxu0 %v1281_v50  ;;  %2661 = vmatpush3.msra.mxu1 %v1383_v49  ;;  %v1595_v49 = vld [vmem:[#allocation2 + $0x780] sm:$0xff] }
 0x3ba   : > { %2630 = vmatpush3.msra.mxu0 %v1281_v50  ;;  %2662 = vmatprep.subr.mxu1 %v1382_v51  ;;  %v1709_v50 = vld [vmem:[#allocation2 + $0x678] sm:$0xff] }
 0x3bb   : > { %2631 = vmatprep.subr.mxu0 %v1280_v52  ;;  %2663 = vmatpush3.msra.mxu1 %v1382_v51 }
 0x3bc   : > { %2632 = vmatpush3.msra.mxu0 %v1280_v52  ;;  %2664 = vmatprep.subr.mxu1 %v1381_v53 }
 0x3bd   : > { %2633 = vmatprep.subr.mxu0 %v1279_v54  ;;  %2665 = vmatpush3.msra.mxu1 %v1381_v53 }
 0x3be   : > { %2634 = vmatpush3.msra.mxu0 %v1279_v54  ;;  %2666 = vmatprep.subr.mxu1 %v1380_v55 }
 0x3bf   : > { %2635 = vmatprep.subr.mxu0 %v1278_v56  ;;  %2667 = vmatpush3.msra.mxu1 %v1380_v55 }
 0x3c0   : > { %2636 = vmatpush3.msra.mxu0 %v1278_v56  ;;  %2668 = vmatprep.subr.mxu1 %v1379_v57 }
 0x3c1   : > { %2637 = vmatprep.subr.mxu0 %v1277_v58  ;;  %2669 = vmatpush3.msra.mxu1 %v1379_v57 }
 0x3c2   : > { %2638 = vmatpush3.msra.mxu0 %v1277_v58  ;;  %2670 = vmatprep.subr.mxu1 %v1378_v59 }
 0x3c3   : > { %2639 = vmatprep.subr.mxu0 %v1276_v60  ;;  %2671 = vmatpush3.msra.mxu1 %v1378_v59 }
 0x3c4   : > { %2640 = vmatpush3.msra.mxu0 %v1276_v60  ;;  %2672 = vmatprep.subr.mxu1 %v1377_v61 }
 0x3c5   : > { %2641 = vmatprep.subr.mxu0 %v1275_v62  ;;  %2673 = vmatpush3.msra.mxu1 %v1377_v61 }
 0x3c6   : > { %2642 = vmatpush3.msra.mxu0 %v1275_v62  ;;  %2674 = vmatprep.subr.mxu1 %v1376_v63 }
 0x3c7   : > { %2643 = vmatprep.subr.mxu0 %v1274_v0  ;;  %2675 = vmatpush3.msra.mxu1 %v1376_v63 }
 0x3c8   : > { %2644 = vmatpush3.msra.mxu0 %v1274_v0  ;;  %2676 = vmatprep.subr.mxu1 %v1375_v2 }
 0x3c9   : > { %2646 = vmatmul.mubr.f32.vlgmr.msra.gmra.mxu0 %v1294_v5  ;;  %2677 = vmatpush3.msra.mxu1 %v1375_v2 }
 0x3ca   : > { %2683 = vmatprep.subr.mxu0 %v2917_v7  ;;  %2678 = vmatprep.subr.mxu1 %v1374_v3 }
 0x3cb   : > { %2684 = vmatpush3.msra.mxu0 %v1519_v6  ;;  %2679 = vmatpush3.msra.mxu1 %v1374_v3 }
 0x3cc   : > { %2685 = vmatprep.subr.mxu0 %v2917_v7  ;;  %2681 = vmatmul.mubr.f32.vlgmr.msra.gmra.mxu1 %v1394_v9 }
 0x3cd   : > { %2686 = vmatpush3.msra.mxu0 %v1518_v8  ;;  %2715 = vmatprep.mubr.msk.f32.mxu0 %vm2918_vm5, %v2917_v7 }
 0x3ce   : > { %2687 = vmatprep.subr.mxu0 %v2917_v7  ;;  %2718 = vmatprep.subr.mxu1 %v2917_v7 }
 0x3cf   : > { %2688 = vmatpush3.msra.mxu0 %v1517_v48  ;;  %2750 = vmatprep.mubr.msk.f32.mxu1 %vm2918_vm5, %v2917_v7 }
 0x3d0   : > { %2689 = vmatprep.subr.mxu0 %v2917_v7  ;;  %2719 = vmatpush3.msra.mxu1 %v1610_v30 }
 0x3d1   : > { %2690 = vmatpush3.msra.mxu0 %v1516_v11  ;;  %2720 = vmatprep.subr.mxu1 %v2917_v7 }
 0x3d2   : > { %2691 = vmatprep.subr.mxu0 %v2917_v7  ;;  %2721 = vmatpush3.msra.mxu1 %v1609_v31  ;;  %v1702_v31 = vld [vmem:[#allocation2 + $0x640] sm:$0xff] }
 0x3d3   : > { %2692 = vmatpush3.msra.mxu0 %v1515_v42  ;;  %2722 = vmatprep.subr.mxu1 %v2917_v7 }
 0x3d4   : > { %2693 = vmatprep.subr.mxu0 %v2917_v7  ;;  %2723 = vmatpush3.msra.mxu1 %v1608_v32  ;;  %v1701_v32 = vld [vmem:[#allocation2 + $0x638] sm:$0xff] }
 0x3d5   : > { %2694 = vmatpush3.msra.mxu0 %v1514_v13  ;;  %2724 = vmatprep.subr.mxu1 %v2917_v7 }
 0x3d6   : > { %2695 = vmatprep.subr.mxu0 %v2917_v7  ;;  %2725 = vmatpush3.msra.mxu1 %v1607_v35  ;;  %v1700_v35 = vld [vmem:[#allocation2 + $0x630] sm:$0xff] }
 0x3d7   : > { %2696 = vmatpush3.msra.mxu0 %v1513_v14  ;;  %2726 = vmatprep.subr.mxu1 %v2917_v7  ;;  %v1520_v14 = vld [vmem:[%s3193_s2 + $0x6] sm:$0x1] }
 0x3d8   : > { %2697 = vmatprep.subr.mxu0 %v2917_v7  ;;  %2727 = vmatpush3.msra.mxu1 %v1606_v36  ;;  %v1699_v36 = vld [vmem:[#allocation2 + $0x628] sm:$0xff] }
 0x3d9   : > { %2698 = vmatpush3.msra.mxu0 %v1512_v16  ;;  %2728 = vmatprep.subr.mxu1 %v2917_v7  ;;  %v1592_v16 = vld [vmem:[%s3193_s2 + $0x7] sm:$0x1] }
 0x3da   : > { %2699 = vmatprep.subr.mxu0 %v2917_v7  ;;  %2729 = vmatpush3.msra.mxu1 %v1605_v37  ;;  %v1698_v37 = vld [vmem:[#allocation2 + $0x620] sm:$0xff] }
 0x3db   : > { %2700 = vmatpush3.msra.mxu0 %v1511_v17  ;;  %2730 = vmatprep.subr.mxu1 %v2917_v7 }
 0x3dc   : > { %2701 = vmatprep.subr.mxu0 %v2917_v7  ;;  %2731 = vmatpush3.msra.mxu1 %v1604_v38  ;;  %v1697_v38 = vld [vmem:[#allocation2 + $0x618] sm:$0xff] }
 0x3dd   : > { %2702 = vmatpush3.msra.mxu0 %v1510_v19  ;;  %2732 = vmatprep.subr.mxu1 %v2917_v7 }
 0x3de   : > { %2703 = vmatprep.subr.mxu0 %v2917_v7  ;;  %2733 = vmatpush3.msra.mxu1 %v1603_v39  ;;  %v1696_v39 = vld [vmem:[#allocation2 + $0x610] sm:$0xff] }
 0x3df   : > { %2704 = vmatpush3.msra.mxu0 %v1509_v20  ;;  %2734 = vmatprep.subr.mxu1 %v2917_v7 }
 0x3e0   : > { %2705 = vmatprep.subr.mxu0 %v2917_v7  ;;  %2735 = vmatpush3.msra.mxu1 %v1602_v40  ;;  %v1695_v40 = vld [vmem:[#allocation2 + $0x608] sm:$0xff] }
 0x3e1   : > { %2706 = vmatpush3.msra.mxu0 %v1508_v22  ;;  %2736 = vmatprep.subr.mxu1 %v2917_v7  ;;  %v1707_v22 = vld [vmem:[#allocation2 + $0x668] sm:$0xff] }
 0x3e2   : > { %2707 = vmatprep.subr.mxu0 %v2917_v7  ;;  %2737 = vmatpush3.msra.mxu1 %v1601_v41 }
 0x3e3   : > { %2708 = vmatpush3.msra.mxu0 %v1507_v23  ;;  %2738 = vmatprep.subr.mxu1 %v2917_v7 }
 0x3e4   : > { %2709 = vmatprep.subr.mxu0 %v2917_v7  ;;  %2739 = vmatpush3.msra.mxu1 %v1600_v43  ;;  %v1694_v43 = vld [vmem:[#allocation2 + $0x600] sm:$0xff] }
 0x3e5   : > { %2710 = vmatpush3.msra.mxu0 %v1506_v25  ;;  %2740 = vmatprep.subr.mxu1 %v2917_v7 }
 0x3e6   : > { %2711 = vmatprep.subr.mxu0 %v2917_v7  ;;  %2741 = vmatpush3.msra.mxu1 %v1599_v44 }
 0x3e7   : > { %2712 = vmatpush3.msra.mxu0 %v1505_v26  ;;  %2742 = vmatprep.subr.mxu1 %v2917_v7  ;;  %v1705_v26 = vld [vmem:[#allocation2 + $0x658] sm:$0xff] }
 0x3e8   : > { %2713 = vmatprep.subr.mxu0 %v2917_v7  ;;  %2743 = vmatpush3.msra.mxu1 %v1598_v45  ;;  %v1725_v45 = vld [vmem:[#allocation2 + $0x6f8] sm:$0xff] }
 0x3e9   : > { %2714 = vmatpush3.msra.mxu0 %v1504_v28  ;;  %2744 = vmatprep.subr.mxu1 %v2917_v7  ;;  %v1704_v28 = vld [vmem:[#allocation2 + $0x650] sm:$0xff] }
 0x3ea   : > { %2716 = vmatmul.mubr.f32.vlgmr.msra.gmra.mxu0 %v1503_v29  ;;  %2745 = vmatpush3.msra.mxu1 %v1597_v46  ;;  %v1703_v29 = vld [vmem:[#allocation2 + $0x648] sm:$0xff]  ;;  %v1724_v46 = vld [vmem:[#allocation2 + $0x6f0] sm:$0xff] }
 0x3eb   : > { %2746 = vmatprep.subr.mxu1 %v2917_v7  ;;  %2753 = vmatprep.subr.mxu0 %v1725_v45 }
 0x3ec   : > { %2747 = vmatpush3.msra.mxu1 %v1596_v47  ;;  %2754 = vmatpush3.msra.mxu0 %v1725_v45  ;;  %v1723_v47 = vld [vmem:[#allocation2 + $0x6e8] sm:$0xff] }
 0x3ed   : > { %2748 = vmatprep.subr.mxu1 %v2917_v7  ;;  %2755 = vmatprep.subr.mxu0 %v1724_v46 }
 0x3ee   : > { %2749 = vmatpush3.msra.mxu1 %v1595_v49  ;;  %2756 = vmatpush3.msra.mxu0 %v1724_v46  ;;  %v1722_v49 = vld [vmem:[#allocation2 + $0x6e0] sm:$0xff] }
 0x3ef   : > { %2788 = vmatprep.subr.mxu1 %v1709_v50  ;;  %2757 = vmatprep.subr.mxu0 %v1723_v47 }
 0x3f0   : > { %2758 = vmatpush3.msra.mxu0 %v1723_v47 }
 0x3f1   : > { %2759 = vmatprep.subr.mxu0 %v1722_v49 }
 0x3f2   : > { %2760 = vmatpush3.msra.mxu0 %v1722_v49 }
 0x446   : > { %v2507_v51 = vpop.f32.mrf.mxu0 }
 0x448   : > { %v986_v52 = vpop.f32.mrf.mxu0 }
 0x449   : > { %v2542_v53 = vpop.f32.mrf.mxu1 }
 0x44a   : > { %v1067_v6 = vadd.f32 %v2542_v53, %v2507_v51  ;;  %v1720_v51 = vld [vmem:[#allocation2 + $0x6d0] sm:$0xff]  ;;  %v1718_v53 = vld [vmem:[#allocation2 + $0x6c0] sm:$0xff] }
 0x44b   : > { %v1061_v55 = vpop.f32.mrf.mxu1 }
 0x44c   : > { %v1062_v58 = vadd.f32 %v1061_v55, %v986_v52  ;;  %v1719_v52 = vld [vmem:[#allocation2 + $0x6c8] sm:$0xff]  ;;  %v1716_v55 = vld [vmem:[#allocation2 + $0x6b0] sm:$0xff] }
 0x467   : > { %v2577_v54 = vpop.f32.mrf.mxu0 }
 0x468   : > { %v1171_v8 = vadd.f32 %v2577_v54, %v1067_v6  ;;  %v1717_v54 = vld [vmem:[#allocation2 + $0x6b8] sm:$0xff] }
 0x469   : > { %v1161_v56 = vpop.f32.mrf.mxu0 }
 0x46a   : > { %v1170_v59 = vadd.f32 %v1161_v56, %v1062_v58  ;;  %v1715_v56 = vld [vmem:[#allocation2 + $0x6a8] sm:$0xff]  ;;  %v1713_v58 = vld [vmem:[#allocation2 + $0x698] sm:$0xff] }
 0x46b   : > { %v2612_v57 = vpop.f32.mrf.mxu1 }
 0x46c   : > { %v1273_v9 = vadd.f32 %v2612_v57, %v1171_v8  ;;  %v1714_v57 = vld [vmem:[#allocation2 + $0x6a0] sm:$0xff] }
 0x46d   : > { %v1263_v60 = vpop.f32.mrf.mxu1 }
 0x46e   : > { %v1272_v62 = vadd.f32 %v1263_v60, %v1170_v59  ;;  %v1712_v59 = vld [vmem:[#allocation2 + $0x690] sm:$0xff]  ;;  %v1711_v60 = vld [vmem:[#allocation2 + $0x688] sm:$0xff] }
 0x489   : > { %v2647_v61 = vpop.f32.mrf.mxu0 }
 0x48a   : > { %v1373_v48 = vadd.f32 %v2647_v61, %v1273_v9  ;;  %v1710_v61 = vld [vmem:[#allocation2 + $0x680] sm:$0xff] }
 0x48b   : > { %v1363_v63 = vpop.f32.mrf.mxu0 }
 0x48c   : > { %v1372_v0 = vadd.f32 %v1363_v63, %v1272_v62  ;;  %v2682_v1 = vpop.f32.mrf.mxu1  ;;  %v1611_v62 = vld [vmem:[%s3193_s2 + $0x5] sm:$0x1] }
 0x48d   : > { %v1473_v10 = vadd.f32 %v2682_v1, %v1373_v48 }
 0x48e   : > { %v1463_v2 = vpop.f32.mrf.mxu1 }
 0x48f   : > { %v1472_v3 = vadd.f32 %v1463_v2, %v1372_v0  ;;  %v1480_v42 = vadd.f32 %v1968_v4, %v1473_v10 }
 0x491   : > { %v1479_v5 = vadd.f32 %v1968_v4, %v1472_v3  ;;  %v1970_v13 = vmul.f32 -1.442695, %v1480_v42 }
 0x493   : > { %v1969_v7 = vmul.f32 -1.442695, %v1479_v5  ;;  %v1688_v5 = vlaneseq }
 0x495   : > { %2859 = vpow2.f32 %v1969_v7  ;;  %v1689_v6 = vshrl.u32 %v1688_v5, 7 }
 0x497   : > { %v1690_v7 = vsub.s32 0, %v1689_v6 }
 0x4a2   : > { %v2860_v11 = vpop.eup %2859 }
 0x4a3   : > { %v1487_v12 = vadd.f32 1.0, %v2860_v11 }
 0x4a5   : > { %2861 = vrcp.f32 %v1487_v12  ;;  %v1972_v12 = vld [vmem:[%s3193_s2 + $0x3] ss:$0 sm:$0xff] }
 0x4a6   : > { %2863 = vpow2.f32 %v1970_v13 }
 0x4aa   : > { %v1587_v15 = vpop.f32.mrf.mxu0 }
 0x4ab   : > { %v1588_v17 = vadd.f32 %v1587_v15, %v1520_v14 }
 0x4ac   : > { %v2717_v18 = vpop.f32.mrf.mxu0 }
 0x4ad   : > { %vm1591_vm6 = vcmp.gt.f32.partialorder %v1588_v17, 0.0  ;;  %v1593_v19 = vmul.f32 %v1592_v16, %v1588_v17 }
 0x4af   : > { %v1594_v20 = vsel %vm1591_vm6, %v1588_v17, %v1593_v19  ;;  %v2872_v19 = vld [vmem:[%s2977_s25] sm:$0xff] }
 0x4b0   : > { %2751 = vmatmul.mubr.f32.vlgmr.msra.gmra.mxu1 %v1594_v20 }
 0x4b1   : > { %2789 = vmatpush3.msra.mxu1 %v1709_v50  ;;  %v1721_v50 = vld [vmem:[#allocation2 + $0x6d8] sm:$0xff] }
 0x4b2   : > { %v2862_v23 = vpop.eup %2861  ;;  %2790 = vmatprep.subr.mxu1 %v1708_v21  ;;  %2761 = vmatprep.subr.mxu0 %v1721_v50 }
 0x4b3   : > { %2791 = vmatpush3.msra.mxu1 %v1708_v21  ;;  %v1493_v25 = vmul.f32 %v2862_v23, %v3026_v33  ;;  %v2864_v27 = vpop.eup %2863  ;;  %2762 = vmatpush3.msra.mxu0 %v1721_v50 }
 0x4b4   : > { %2792 = vmatprep.subr.mxu1 %v1707_v22  ;;  %v1488_v30 = vadd.f32 1.0, %v2864_v27  ;;  %2763 = vmatprep.subr.mxu0 %v1720_v51 }
 0x4b5   : > { %2793 = vmatpush3.msra.mxu1 %v1707_v22  ;;  %2820 = vmatprep.mubr.f32.mxu1 %v1493_v25 }
 0x4b6   : > { %2794 = vmatprep.subr.mxu1 %v1706_v24  ;;  %2865 = vrcp.f32 %v1488_v30  ;;  %2764 = vmatpush3.msra.mxu0 %v1720_v51 }
 0x4b7   : > { %2795 = vmatpush3.msra.mxu1 %v1706_v24  ;;  %2765 = vmatprep.subr.mxu0 %v1719_v52 }
 0x4b8   : > { %2796 = vmatprep.subr.mxu1 %v1705_v26  ;;  %2766 = vmatpush3.msra.mxu0 %v1719_v52 }
 0x4b9   : > { %2797 = vmatpush3.msra.mxu1 %v1705_v26  ;;  %2767 = vmatprep.subr.mxu0 %v1718_v53 }
 0x4ba   : > { %2798 = vmatprep.subr.mxu1 %v1704_v28  ;;  %2768 = vmatpush3.msra.mxu0 %v1718_v53 }
 0x4bb   : > { %2799 = vmatpush3.msra.mxu1 %v1704_v28  ;;  %2769 = vmatprep.subr.mxu0 %v1717_v54 }
 0x4bc   : > { %2800 = vmatprep.subr.mxu1 %v1703_v29  ;;  %2770 = vmatpush3.msra.mxu0 %v1717_v54 }
 0x4bd   : > { %2801 = vmatpush3.msra.mxu1 %v1703_v29  ;;  %2771 = vmatprep.subr.mxu0 %v1716_v55 }
 0x4be   : > { %2802 = vmatprep.subr.mxu1 %v1702_v31  ;;  %2772 = vmatpush3.msra.mxu0 %v1716_v55 }
 0x4bf   : > { %2803 = vmatpush3.msra.mxu1 %v1702_v31  ;;  %2773 = vmatprep.subr.mxu0 %v1715_v56 }
 0x4c0   : > { %2804 = vmatprep.subr.mxu1 %v1701_v32  ;;  %2774 = vmatpush3.msra.mxu0 %v1715_v56 }
 0x4c1   : > { %2805 = vmatpush3.msra.mxu1 %v1701_v32  ;;  %2775 = vmatprep.subr.mxu0 %v1714_v57 }
 0x4c2   : > { %2806 = vmatprep.subr.mxu1 %v1700_v35  ;;  %2776 = vmatpush3.msra.mxu0 %v1714_v57 }
 0x4c3   : > { %2807 = vmatpush3.msra.mxu1 %v1700_v35  ;;  %v2866_v41 = vpop.eup %2865  ;;  %2777 = vmatprep.subr.mxu0 %v1713_v58 }
 0x4c4   : > { %2808 = vmatprep.subr.mxu1 %v1699_v36  ;;  %v1494_v44 = vmul.f32 %v2866_v41, %v3029_v34  ;;  %2778 = vmatpush3.msra.mxu0 %v1713_v58 }
 0x4c5   : > { %2809 = vmatpush3.msra.mxu1 %v1699_v36  ;;  %2779 = vmatprep.subr.mxu0 %v1712_v59 }
 0x4c6   : > { %2810 = vmatprep.subr.mxu1 %v1698_v37  ;;  %2780 = vmatpush3.msra.mxu0 %v1712_v59 }
 0x4c7   : > { %2811 = vmatpush3.msra.mxu1 %v1698_v37  ;;  %2781 = vmatprep.subr.mxu0 %v1711_v60 }
 0x4c8   : > { %2812 = vmatprep.subr.mxu1 %v1697_v38  ;;  %2782 = vmatpush3.msra.mxu0 %v1711_v60 }
 0x4c9   : > { %2813 = vmatpush3.msra.mxu1 %v1697_v38  ;;  %2783 = vmatprep.subr.mxu0 %v1710_v61 }
 0x4ca   : > { %2814 = vmatprep.subr.mxu1 %v1696_v39  ;;  %2784 = vmatpush3.msra.mxu0 %v1710_v61 }
 0x4cb   : > { %2815 = vmatpush3.msra.mxu1 %v1696_v39 }
 0x4cc   : > { %2816 = vmatprep.subr.mxu1 %v1695_v40 }
 0x4cd   : > { %2817 = vmatpush3.msra.mxu1 %v1695_v40 }
 0x4ce   : > { %2818 = vmatprep.subr.mxu1 %v1694_v43 }
 0x4cf   : > { %2819 = vmatpush3.msra.mxu1 %v1694_v43 }
 0x4d0   : > { %2821 = vmatmul.mubr.f32.vlgmr.msra.gmra.mxu1 %v1494_v44 }
 0x570   : > { %v1678_v63 = vpop.f32.mrf.mxu1 }
 0x571   : > { %v1679_v0 = vadd.f32 %v1678_v63, %v1611_v62 }
 0x572   : > { %v2752_v1 = vpop.f32.mrf.mxu1 }
 0x573   : > { %v1971_v2 = vmul.f32 -1.442695, %v1679_v0 }
 0x575   : > { %2867 = vpow2.f32 %v1971_v2 }
 0x582   : > { %v2868_v3 = vpop.eup %2867 }
 0x583   : > { %v1685_v4 = vadd.f32 1.0, %v2868_v3 }
 0x585   : > { %2869 = vrcp.f32 %v1685_v4 }
 0x590   : > { %v2822_v11 = vpop.f32.mrf.mxu1 }
 0x592   : > { %v2870_v8 = vpop.eup %2869  ;;  %v1867_v14 = vpop.f32.mrf.mxu1 }
 0x593   : > { %v1691_v9 = vrot.slane %v2870_v8, %v1690_v7 }
 0x595   : > { %v1692_v48 = vmul.f32 %v1691_v9, %v3026_v33  ;;  %v1693_v10 = vmul.f32 %v1691_v9, %v3029_v34  ;;  %v2871_v33 = vld [vmem:[%s2977_s25 + $0x8] sm:$0xff] }
 0x597   : > { %2785 = vmatprep.mubr.f32.mxu0 %v1692_v48 }
 0x598   : > { %2786 = vmatmul.mubr.f32.vlgmr.msra.gmra.mxu0 %v1693_v10 }
 0x658   : > { %v2787_v42 = vpop.f32.mrf.mxu0 }
 0x659   : > { %v1873_v13 = vadd.f32 %v2822_v11, %v2787_v42 }
 0x65a   : > { %v1792_v15 = vpop.f32.mrf.mxu0 }
 0x65b   : > { %v1882_v16 = vadd.f32 %v1972_v12, %v1873_v13  ;;  %v1868_v17 = vadd.f32 %v1867_v14, %v1792_v15 }
 0x65d   : > { %v1884_v34 = vadd.f32 %v2871_v33, %v1882_v16  ;;  %v1881_v18 = vadd.f32 %v1972_v12, %v1868_v17 }
 0x65f   : > { %1886 = vst [vmem:[%s185_s23 + $0x8] sm:$0xff] %v1884_v34  ;;  %v1883_v20 = vadd.f32 %v2872_v19, %v1881_v18 }
 0x661   : > { %1885 = vst [vmem:[%s185_s23] sm:$0xff] %v1883_v20 }
 0x662 PF: > { %s14_s12 = sadd.s32 1, %s2909_s12  }
 0x663   : > { %p11_p1 = scmp.ge.s32.totalorder %s14_s12, 4  }
 0x665   :  { %13 = sbr.rel (!%p11_p1) target bundleno = 1 (0x1), region = 67 }
 0x66a   :  { %1908 = vsyncpa [#allocation3], 1 }
 0x66b   :  { %1910 = vsyncpa [#allocation3 + $0x1], 1 }

</bundles_post_ra>
